<compile_context>
chip_gen: v7x
topology: tpu7x:2x2x1
jax: 0.10.0
libtpu: 0.0.40
codegen_flags: <defaults>
</compile_context>

<pallas_src>
import functools

import jax
import jax.numpy as jnp
from jax.experimental import pallas as pl
from jax.experimental.pallas import tpu as pltpu


# --------------------------------------------------------------------------
# Fused kernel: one-hot embed gather -> L stacked LSTM layers -> FC.
# --------------------------------------------------------------------------
def _make_fused_kernel(num_layers):
    L = num_layers

    def kernel(*refs):
        # refs: ids, embed, w_ih0, w_hh0, b0, (wcat_l, b_l)*{L-1},
        #       h0, c0, fc_w, fc_b, out
        ids_ref, embed_ref, w_ih0_ref, w_hh0_ref, b0_ref = refs[:5]
        layer_refs = refs[5:5 + 2 * (L - 1)]
        h0_ref, c0_ref, fcw_ref, fcb_ref, o_ref = refs[5 + 2 * (L - 1):]

        TBp = ids_ref.shape[0]
        V = embed_ref.shape[0]
        Bp, H = h0_ref.shape[1], h0_ref.shape[2]
        T = TBp // Bp

        # ---- fused embedding gather + layer-0 input projection --------------
        # Gather as a one-hot matmul (exact row selection); the vocab table is
        # projected straight to gate space so layer-0's x @ W_ih^T is shared.
        ids = ids_ref[...]                                          # (T*Bp, 1) i32
        onehot = (ids == jax.lax.broadcasted_iota(
            jnp.int32, (TBp, V), 1)).astype(jnp.float32)            # (T*Bp, V)
        vocab_gates = jnp.dot(embed_ref[...], w_ih0_ref[...],
                              preferred_element_type=jnp.float32)   # (V, 4H)
        gx0 = (jnp.dot(onehot, vocab_gates,
                       preferred_element_type=jnp.float32)
               + jnp.broadcast_to(b0_ref[...], (TBp, 4 * H)))       # (T*Bp, 4H)

        # ---- loop-invariant weight / bias hoists (few vregs at H=32) --------
        # TODO(synk): at H >= 128 keep these as Refs / tile the 4H axis instead
        # of hoisting into vregs, to bound register pressure.
        w_hh0 = w_hh0_ref[...]                                      # (H, 4H)
        wcat = [layer_refs[2 * i][...] for i in range(L - 1)]       # (2H, 4H)
        bias = [jnp.broadcast_to(layer_refs[2 * i + 1][...], (Bp, 4 * H))
                for i in range(L - 1)]                              # hoisted bcast

        hs = [h0_ref[l] for l in range(L)]
        cs = [c0_ref[l] for l in range(L)]

        # Gate columns pre-permuted to [i, f, o, g]: one sigmoid over the
        # contiguous 3H slab, one tanh over the trailing H columns.
        def lstm_cell(gates, c_prev):
            sig = jax.nn.sigmoid(gates[:, :3 * H])
            g_g = jnp.tanh(gates[:, 3 * H:])
            i_g = sig[:, 0 * H:1 * H]
            f_g = sig[:, 1 * H:2 * H]
            o_g = sig[:, 2 * H:3 * H]
            c_new = f_g * c_prev + i_g * g_g
            h_new = o_g * jnp.tanh(c_new)
            return h_new, c_new

        # Fully unrolled time loop (T static & small); layers advance in
        # lockstep so the inter-layer (T, B, H) sequence is never materialized.
        for t in range(T):
            gates = gx0[t * Bp:(t + 1) * Bp, :] + jnp.dot(
                hs[0], w_hh0, preferred_element_type=jnp.float32)
            hs[0], cs[0] = lstm_cell(gates, cs[0])
            for l in range(1, L):
                hin = jnp.concatenate([hs[l - 1], hs[l]], axis=1)   # (Bp, 2H)
                gates = jnp.dot(hin, wcat[l - 1],
                                preferred_element_type=jnp.float32) + bias[l - 1]
                hs[l], cs[l] = lstm_cell(gates, cs[l])

        # TODO(synk): nn.Dropout(0.5) implemented as inference-mode identity.
        o_ref[...] = (jnp.dot(hs[L - 1], fcw_ref[...],
                              preferred_element_type=jnp.float32)
                      + fcb_ref[...])

    return kernel


# --------------------------------------------------------------------------
# One-time parameter packing: gate re-order [i,f,g,o]->[i,f,o,g], per-layer
# [W_ih; W_hh] concat for layers >= 1, and lane-padding of the FC head.
# --------------------------------------------------------------------------
def pack_params(params, num_layers, hidden_size, num_classes):
    H = hidden_size

    def reorder(w):  # last-dim gate columns [i, f, g, o] -> [i, f, o, g]
        return jnp.concatenate(
            [w[..., :2 * H], w[..., 3 * H:4 * H], w[..., 2 * H:3 * H]], axis=-1)

    packed = {
        "embed": params["embed"],
        "w_ih0": reorder(params["w_ih_t_0"]),
        "w_hh0": reorder(params["w_hh_t_0"]),
        "b0": reorder(params["b_0"]),
    }
    for l in range(1, num_layers):
        packed[f"wcat_{l}"] = jnp.concatenate(
            [reorder(params[f"w_ih_t_{l}"]), reorder(params[f"w_hh_t_{l}"])],
            axis=0)                                                # (2H, 4H)
        packed[f"b_{l}"] = reorder(params[f"b_{l}"])
    c_pad = max(128, -(-num_classes // 128) * 128)
    packed["fc_w"] = jnp.zeros((H, c_pad), jnp.float32).at[
        :, :num_classes].set(params["fc_w_t"])
    packed["fc_b"] = jnp.zeros((1, c_pad), jnp.float32).at[
        :, :num_classes].set(params["fc_b"])
    return packed


# --------------------------------------------------------------------------
# Full forward pass (matches torch RNNClassifier.forward, eval mode).
# --------------------------------------------------------------------------
@functools.partial(jax.jit, static_argnames=("num_layers", "num_classes"))
def rnn_classifier_forward(tokens, packed, h0, c0, num_layers, num_classes):
    B, T = tokens.shape
    H = h0.shape[-1]
    Bp = -(-B // 8) * 8                     # pad batch to the 8-sublane width
    Cp = packed["fc_w"].shape[1]

    # Pad rows use token id 0 / zero state; rows never interact across batch,
    # and the padding is sliced away from the output.
    tok_p = jnp.zeros((Bp, T), jnp.int32).at[:B].set(tokens.astype(jnp.int32))
    ids = jnp.transpose(tok_p).reshape(T * Bp, 1)   # time-major, tile-aligned
    h0_p = jnp.zeros((num_layers, Bp, H), jnp.float32).at[:, :B].set(h0)
    c0_p = jnp.zeros((num_layers, Bp, H), jnp.float32).at[:, :B].set(c0)

    args = [ids, packed["embed"], packed["w_ih0"], packed["w_hh0"], packed["b0"]]
    for l in range(1, num_layers):
        args += [packed[f"wcat_{l}"], packed[f"b_{l}"]]
    args += [h0_p, c0_p, packed["fc_w"], packed["fc_b"]]

    vmem = pl.BlockSpec(memory_space=pltpu.MemorySpace.VMEM)
    out = pl.pallas_call(
        _make_fused_kernel(num_layers),
        out_shape=jax.ShapeDtypeStruct((Bp, Cp), jnp.float32),
        in_specs=[vmem] * len(args),
        out_specs=vmem,
        # TODO(synk): when H/T/B scale (esp. v7x's 64 MiB VMEM), switch to a
        # batch/time grid with BlockSpec pipelining + vmem_limit_bytes, mark the
        # batch axis "parallel" for v7x's 2 TensorCores, and cast dot operands
        # to bf16 (f32 accumulate) on v6e/v7x.
    )(*args)
    return out[:B, :num_classes]


# --------------------------------------------------------------------------
# Pure-JAX reference (mirrors torch.nn.LSTM semantics) for validation.
# --------------------------------------------------------------------------
def _reference_forward(tokens, params, h0, c0, num_layers):
    x = jnp.take(params["embed"], tokens, axis=0)             # (B, T, E)
    B, T, _ = x.shape
    H = h0.shape[-1]
    inp = x
    for l in range(num_layers):
        wih, whh, b = (params[f"w_ih_t_{l}"], params[f"w_hh_t_{l}"],
                       params[f"b_{l}"])
        h, c = h0[l], c0[l]
        outs = []
        for t in range(T):
            gates = inp[:, t, :] @ wih + h @ whh + b
            i_g = jax.nn.sigmoid(gates[:, 0 * H:1 * H])
            f_g = jax.nn.sigmoid(gates[:, 1 * H:2 * H])
            g_g = jnp.tanh(gates[:, 2 * H:3 * H])
            o_g = jax.nn.sigmoid(gates[:, 3 * H:4 * H])
            c = f_g * c + i_g * g_g
            h = o_g * jnp.tanh(c)
            outs.append(h)
        inp = jnp.stack(outs, axis=1)
    return inp[:, -1, :] @ params["fc_w_t"] + params["fc_b"]


def make_params(key, voca_size, embed_size, hidden_size, num_layers, num_classes):
    keys = jax.random.split(key, 4 + 4 * num_layers)
    params = {}
    params["embed"] = jax.random.normal(
        keys[0], (voca_size, embed_size), jnp.float32)
    bound = 1.0 / jnp.sqrt(hidden_size)
    for layer in range(num_layers):
        in_dim = embed_size if layer == 0 else hidden_size
        k0, k1, k2, k3 = keys[1 + 4 * layer: 5 + 4 * layer]
        w_ih = jax.random.uniform(k0, (4 * hidden_size, in_dim),
                                  jnp.float32, -bound, bound)
        w_hh = jax.random.uniform(k1, (4 * hidden_size, hidden_size),
                                  jnp.float32, -bound, bound)
        b_ih = jax.random.uniform(k2, (4 * hidden_size,),
                                  jnp.float32, -bound, bound)
        b_hh = jax.random.uniform(k3, (4 * hidden_size,),
                                  jnp.float32, -bound, bound)
        params[f"w_ih_t_{layer}"] = w_ih.T                    # (in, 4H)
        params[f"w_hh_t_{layer}"] = w_hh.T                    # (H, 4H)
        params[f"b_{layer}"] = (b_ih + b_hh)[None, :]         # (1, 4H)
    params["fc_w_t"] = (0.01 * jax.random.normal(
        keys[-3], (num_classes, hidden_size), jnp.float32)).T  # (H, C)
    params["fc_b"] = 0.01 * jax.random.normal(
        keys[-2], (1, num_classes), jnp.float32)               # (1, C)
    return params, keys[-1]


if __name__ == "__main__":
    voca_size, embed_size, hidden_size = 50, 32, 32
    num_layers, num_classes = 2, 4
    B, T = 2, 8

    key = jax.random.PRNGKey(0)
    key, k_tok, k_h0, k_c0 = jax.random.split(key, 4)

    params, _ = make_params(key, voca_size, embed_size, hidden_size,
                            num_layers, num_classes)
    packed = pack_params(params, num_layers, hidden_size, num_classes)

    tokens = jax.random.randint(k_tok, (B, T), 0, voca_size, dtype=jnp.int32)

    # h0/c0: xavier_normal on a (num_layers, B, H) tensor (as in the torch code)
    fan_in = B * hidden_size
    fan_out = num_layers * hidden_size
    std = (2.0 / (fan_in + fan_out)) ** 0.5
    h0 = std * jax.random.normal(k_h0, (num_layers, B, hidden_size), jnp.float32)
    c0 = std * jax.random.normal(k_c0, (num_layers, B, hidden_size), jnp.float32)

    out = rnn_classifier_forward(tokens, packed, h0, c0,
                                 num_layers, num_classes)
    out = jax.block_until_ready(out)
    assert out.shape == (B, num_classes)

    ref = _reference_forward(tokens, params, h0, c0, num_layers)
    assert jnp.allclose(out, ref, rtol=1e-4, atol=1e-4), "mismatch vs reference"

    print("KERNEL_OK")
</pallas_src>

<mosaic_0001>
module attributes {stable_mosaic.version = 11 : i64} {
  func.func @kernel(%arg0: memref<64x1xi32, #tpu.memory_space<vmem>>, %arg1: memref<50x32xf32, #tpu.memory_space<vmem>>, %arg2: memref<32x128xf32, #tpu.memory_space<vmem>>, %arg3: memref<32x128xf32, #tpu.memory_space<vmem>>, %arg4: memref<1x128xf32, #tpu.memory_space<vmem>>, %arg5: memref<64x128xf32, #tpu.memory_space<vmem>>, %arg6: memref<1x128xf32, #tpu.memory_space<vmem>>, %arg7: memref<2x8x32xf32, #tpu.memory_space<vmem>>, %arg8: memref<2x8x32xf32, #tpu.memory_space<vmem>>, %arg9: memref<32x128xf32, #tpu.memory_space<vmem>>, %arg10: memref<1x128xf32, #tpu.memory_space<vmem>>, %arg11: memref<8x128xf32, #tpu.memory_space<vmem>>) attributes {dimension_semantics = [], scalar_prefetch = 0 : i64, scratch_operands = 0 : i64, tpu.core_type = #tpu.core_type<tc>} {
    %c0 = arith.constant 0 : index
    %c0_0 = arith.constant 0 : index
    %0 = vector.load %arg0[%c0, %c0_0] : memref<64x1xi32, #tpu.memory_space<vmem>>, vector<64x1xi32>
    %1 = tpu.iota {dimensions = array<i32: 1>} : vector<64x50xi32>
    %2 = vector.broadcast %0 : vector<64x1xi32> to vector<64x50xi32>
    %3 = arith.cmpi eq, %2, %1 : vector<64x50xi32>
    %4 = arith.extui %3 : vector<64x50xi1> to vector<64x50xi32>
    %5 = arith.sitofp %4 : vector<64x50xi32> to vector<64x50xf32>
    %c0_1 = arith.constant 0 : index
    %c0_2 = arith.constant 0 : index
    %6 = vector.load %arg1[%c0_1, %c0_2] : memref<50x32xf32, #tpu.memory_space<vmem>>, vector<50x32xf32>
    %c0_3 = arith.constant 0 : index
    %c0_4 = arith.constant 0 : index
    %7 = vector.load %arg2[%c0_3, %c0_4] : memref<32x128xf32, #tpu.memory_space<vmem>>, vector<32x128xf32>
    %cst = arith.constant dense<0.000000e+00> : vector<50x128xf32>
    %8 = tpu.matmul %6, %7, %cst {dimension_numbers = #tpu.dot_dimension_numbers<[1], [0], [0], [1], [0, 0, 1, 1], [], []>} : vector<50x32xf32>, vector<32x128xf32>, vector<50x128xf32> -> vector<50x128xf32>
    %cst_5 = arith.constant dense<0.000000e+00> : vector<64x128xf32>
    %9 = tpu.matmul %5, %8, %cst_5 {dimension_numbers = #tpu.dot_dimension_numbers<[1], [0], [0], [1], [0, 0, 1, 1], [], []>} : vector<64x50xf32>, vector<50x128xf32>, vector<64x128xf32> -> vector<64x128xf32>
    %c0_6 = arith.constant 0 : index
    %c0_7 = arith.constant 0 : index
    %10 = vector.load %arg4[%c0_6, %c0_7] : memref<1x128xf32, #tpu.memory_space<vmem>>, vector<1x128xf32>
    %11 = vector.shape_cast %10 : vector<1x128xf32> to vector<1x128xf32>
    %12 = vector.broadcast %11 : vector<1x128xf32> to vector<64x128xf32>
    %13 = arith.addf %9, %12 : vector<64x128xf32>
    %c0_8 = arith.constant 0 : index
    %c0_9 = arith.constant 0 : index
    %14 = vector.load %arg3[%c0_8, %c0_9] : memref<32x128xf32, #tpu.memory_space<vmem>>, vector<32x128xf32>
    %c0_10 = arith.constant 0 : index
    %c0_11 = arith.constant 0 : index
    %15 = vector.load %arg5[%c0_10, %c0_11] : memref<64x128xf32, #tpu.memory_space<vmem>>, vector<64x128xf32>
    %c0_12 = arith.constant 0 : index
    %c0_13 = arith.constant 0 : index
    %16 = vector.load %arg6[%c0_12, %c0_13] : memref<1x128xf32, #tpu.memory_space<vmem>>, vector<1x128xf32>
    %17 = vector.shape_cast %16 : vector<1x128xf32> to vector<1x128xf32>
    %18 = vector.broadcast %17 : vector<1x128xf32> to vector<8x128xf32>
    %c0_14 = arith.constant 0 : index
    %c0_15 = arith.constant 0 : index
    %c0_16 = arith.constant 0 : index
    %19 = vector.load %arg7[%c0_14, %c0_15, %c0_16] : memref<2x8x32xf32, #tpu.memory_space<vmem>>, vector<1x8x32xf32>
    %20 = vector.shape_cast %19 : vector<1x8x32xf32> to vector<8x32xf32>
    %c1 = arith.constant 1 : index
    %c0_17 = arith.constant 0 : index
    %c0_18 = arith.constant 0 : index
    %21 = vector.load %arg7[%c1, %c0_17, %c0_18] : memref<2x8x32xf32, #tpu.memory_space<vmem>>, vector<1x8x32xf32>
    %22 = vector.shape_cast %21 : vector<1x8x32xf32> to vector<8x32xf32>
    %c0_19 = arith.constant 0 : index
    %c0_20 = arith.constant 0 : index
    %c0_21 = arith.constant 0 : index
    %23 = vector.load %arg8[%c0_19, %c0_20, %c0_21] : memref<2x8x32xf32, #tpu.memory_space<vmem>>, vector<1x8x32xf32>
    %24 = vector.shape_cast %23 : vector<1x8x32xf32> to vector<8x32xf32>
    %c1_22 = arith.constant 1 : index
    %c0_23 = arith.constant 0 : index
    %c0_24 = arith.constant 0 : index
    %25 = vector.load %arg8[%c1_22, %c0_23, %c0_24] : memref<2x8x32xf32, #tpu.memory_space<vmem>>, vector<1x8x32xf32>
    %26 = vector.shape_cast %25 : vector<1x8x32xf32> to vector<8x32xf32>
    %27 = vector.extract_strided_slice %13 {offsets = [0, 0], sizes = [8, 128], strides = [1, 1]} : vector<64x128xf32> to vector<8x128xf32>
    %cst_25 = arith.constant dense<0.000000e+00> : vector<8x128xf32>
    %28 = tpu.matmul %20, %14, %cst_25 {dimension_numbers = #tpu.dot_dimension_numbers<[1], [0], [0], [1], [0, 0, 1, 1], [], []>} : vector<8x32xf32>, vector<32x128xf32>, vector<8x128xf32> -> vector<8x128xf32>
    %29 = arith.addf %27, %28 : vector<8x128xf32>
    %30 = vector.extract_strided_slice %29 {offsets = [0, 0], sizes = [8, 96], strides = [1, 1]} : vector<8x128xf32> to vector<8x96xf32>
    %31 = arith.negf %30 : vector<8x96xf32>
    %32 = math.exp %31 : vector<8x96xf32>
    %cst_26 = arith.constant 1.000000e+00 : f32
    %33 = vector.broadcast %cst_26 : f32 to vector<8x96xf32>
    %34 = arith.addf %33, %32 : vector<8x96xf32>
    %35 = arith.divf %33, %34 : vector<8x96xf32>
    %36 = vector.extract_strided_slice %29 {offsets = [0, 96], sizes = [8, 32], strides = [1, 1]} : vector<8x128xf32> to vector<8x32xf32>
    %37 = math.tanh %36 : vector<8x32xf32>
    %38 = vector.extract_strided_slice %35 {offsets = [0, 0], sizes = [8, 32], strides = [1, 1]} : vector<8x96xf32> to vector<8x32xf32>
    %39 = vector.extract_strided_slice %35 {offsets = [0, 32], sizes = [8, 32], strides = [1, 1]} : vector<8x96xf32> to vector<8x32xf32>
    %40 = vector.extract_strided_slice %35 {offsets = [0, 64], sizes = [8, 32], strides = [1, 1]} : vector<8x96xf32> to vector<8x32xf32>
    %41 = arith.mulf %39, %24 : vector<8x32xf32>
    %42 = arith.mulf %38, %37 : vector<8x32xf32>
    %43 = arith.addf %41, %42 : vector<8x32xf32>
    %44 = math.tanh %43 : vector<8x32xf32>
    %45 = arith.mulf %40, %44 : vector<8x32xf32>
    %46 = tpu.concatenate %45, %22 in 1 : vector<8x32xf32>, vector<8x32xf32> -> vector<8x64xf32>
    %cst_27 = arith.constant dense<0.000000e+00> : vector<8x128xf32>
    %47 = tpu.matmul %46, %15, %cst_27 {dimension_numbers = #tpu.dot_dimension_numbers<[1], [0], [0], [1], [0, 0, 1, 1], [], []>} : vector<8x64xf32>, vector<64x128xf32>, vector<8x128xf32> -> vector<8x128xf32>
    %48 = arith.addf %47, %18 : vector<8x128xf32>
    %49 = vector.extract_strided_slice %48 {offsets = [0, 0], sizes = [8, 96], strides = [1, 1]} : vector<8x128xf32> to vector<8x96xf32>
    %50 = arith.negf %49 : vector<8x96xf32>
    %51 = math.exp %50 : vector<8x96xf32>
    %cst_28 = arith.constant 1.000000e+00 : f32
    %52 = vector.broadcast %cst_28 : f32 to vector<8x96xf32>
    %53 = arith.addf %52, %51 : vector<8x96xf32>
    %54 = arith.divf %52, %53 : vector<8x96xf32>
    %55 = vector.extract_strided_slice %48 {offsets = [0, 96], sizes = [8, 32], strides = [1, 1]} : vector<8x128xf32> to vector<8x32xf32>
    %56 = math.tanh %55 : vector<8x32xf32>
    %57 = vector.extract_strided_slice %54 {offsets = [0, 0], sizes = [8, 32], strides = [1, 1]} : vector<8x96xf32> to vector<8x32xf32>
    %58 = vector.extract_strided_slice %54 {offsets = [0, 32], sizes = [8, 32], strides = [1, 1]} : vector<8x96xf32> to vector<8x32xf32>
    %59 = vector.extract_strided_slice %54 {offsets = [0, 64], sizes = [8, 32], strides = [1, 1]} : vector<8x96xf32> to vector<8x32xf32>
    %60 = arith.mulf %58, %26 : vector<8x32xf32>
    %61 = arith.mulf %57, %56 : vector<8x32xf32>
    %62 = arith.addf %60, %61 : vector<8x32xf32>
    %63 = math.tanh %62 : vector<8x32xf32>
    %64 = arith.mulf %59, %63 : vector<8x32xf32>
    %65 = vector.extract_strided_slice %13 {offsets = [8, 0], sizes = [8, 128], strides = [1, 1]} : vector<64x128xf32> to vector<8x128xf32>
    %cst_29 = arith.constant dense<0.000000e+00> : vector<8x128xf32>
    %66 = tpu.matmul %45, %14, %cst_29 {dimension_numbers = #tpu.dot_dimension_numbers<[1], [0], [0], [1], [0, 0, 1, 1], [], []>} : vector<8x32xf32>, vector<32x128xf32>, vector<8x128xf32> -> vector<8x128xf32>
    %67 = arith.addf %65, %66 : vector<8x128xf32>
    %68 = vector.extract_strided_slice %67 {offsets = [0, 0], sizes = [8, 96], strides = [1, 1]} : vector<8x128xf32> to vector<8x96xf32>
    %69 = arith.negf %68 : vector<8x96xf32>
    %70 = math.exp %69 : vector<8x96xf32>
    %cst_30 = arith.constant 1.000000e+00 : f32
    %71 = vector.broadcast %cst_30 : f32 to vector<8x96xf32>
    %72 = arith.addf %71, %70 : vector<8x96xf32>
    %73 = arith.divf %71, %72 : vector<8x96xf32>
    %74 = vector.extract_strided_slice %67 {offsets = [0, 96], sizes = [8, 32], strides = [1, 1]} : vector<8x128xf32> to vector<8x32xf32>
    %75 = math.tanh %74 : vector<8x32xf32>
    %76 = vector.extract_strided_slice %73 {offsets = [0, 0], sizes = [8, 32], strides = [1, 1]} : vector<8x96xf32> to vector<8x32xf32>
    %77 = vector.extract_strided_slice %73 {offsets = [0, 32], sizes = [8, 32], strides = [1, 1]} : vector<8x96xf32> to vector<8x32xf32>
    %78 = vector.extract_strided_slice %73 {offsets = [0, 64], sizes = [8, 32], strides = [1, 1]} : vector<8x96xf32> to vector<8x32xf32>
    %79 = arith.mulf %77, %43 : vector<8x32xf32>
    %80 = arith.mulf %76, %75 : vector<8x32xf32>
    %81 = arith.addf %79, %80 : vector<8x32xf32>
    %82 = math.tanh %81 : vector<8x32xf32>
    %83 = arith.mulf %78, %82 : vector<8x32xf32>
    %84 = tpu.concatenate %83, %64 in 1 : vector<8x32xf32>, vector<8x32xf32> -> vector<8x64xf32>
    %cst_31 = arith.constant dense<0.000000e+00> : vector<8x128xf32>
    %85 = tpu.matmul %84, %15, %cst_31 {dimension_numbers = #tpu.dot_dimension_numbers<[1], [0], [0], [1], [0, 0, 1, 1], [], []>} : vector<8x64xf32>, vector<64x128xf32>, vector<8x128xf32> -> vector<8x128xf32>
    %86 = arith.addf %85, %18 : vector<8x128xf32>
    %87 = vector.extract_strided_slice %86 {offsets = [0, 0], sizes = [8, 96], strides = [1, 1]} : vector<8x128xf32> to vector<8x96xf32>
    %88 = arith.negf %87 : vector<8x96xf32>
    %89 = math.exp %88 : vector<8x96xf32>
    %cst_32 = arith.constant 1.000000e+00 : f32
    %90 = vector.broadcast %cst_32 : f32 to vector<8x96xf32>
    %91 = arith.addf %90, %89 : vector<8x96xf32>
    %92 = arith.divf %90, %91 : vector<8x96xf32>
    %93 = vector.extract_strided_slice %86 {offsets = [0, 96], sizes = [8, 32], strides = [1, 1]} : vector<8x128xf32> to vector<8x32xf32>
    %94 = math.tanh %93 : vector<8x32xf32>
    %95 = vector.extract_strided_slice %92 {offsets = [0, 0], sizes = [8, 32], strides = [1, 1]} : vector<8x96xf32> to vector<8x32xf32>
    %96 = vector.extract_strided_slice %92 {offsets = [0, 32], sizes = [8, 32], strides = [1, 1]} : vector<8x96xf32> to vector<8x32xf32>
    %97 = vector.extract_strided_slice %92 {offsets = [0, 64], sizes = [8, 32], strides = [1, 1]} : vector<8x96xf32> to vector<8x32xf32>
    %98 = arith.mulf %96, %62 : vector<8x32xf32>
    %99 = arith.mulf %95, %94 : vector<8x32xf32>
    %100 = arith.addf %98, %99 : vector<8x32xf32>
    %101 = math.tanh %100 : vector<8x32xf32>
    %102 = arith.mulf %97, %101 : vector<8x32xf32>
    %103 = vector.extract_strided_slice %13 {offsets = [16, 0], sizes = [8, 128], strides = [1, 1]} : vector<64x128xf32> to vector<8x128xf32>
    %cst_33 = arith.constant dense<0.000000e+00> : vector<8x128xf32>
    %104 = tpu.matmul %83, %14, %cst_33 {dimension_numbers = #tpu.dot_dimension_numbers<[1], [0], [0], [1], [0, 0, 1, 1], [], []>} : vector<8x32xf32>, vector<32x128xf32>, vector<8x128xf32> -> vector<8x128xf32>
    %105 = arith.addf %103, %104 : vector<8x128xf32>
    %106 = vector.extract_strided_slice %105 {offsets = [0, 0], sizes = [8, 96], strides = [1, 1]} : vector<8x128xf32> to vector<8x96xf32>
    %107 = arith.negf %106 : vector<8x96xf32>
    %108 = math.exp %107 : vector<8x96xf32>
    %cst_34 = arith.constant 1.000000e+00 : f32
    %109 = vector.broadcast %cst_34 : f32 to vector<8x96xf32>
    %110 = arith.addf %109, %108 : vector<8x96xf32>
    %111 = arith.divf %109, %110 : vector<8x96xf32>
    %112 = vector.extract_strided_slice %105 {offsets = [0, 96], sizes = [8, 32], strides = [1, 1]} : vector<8x128xf32> to vector<8x32xf32>
    %113 = math.tanh %112 : vector<8x32xf32>
    %114 = vector.extract_strided_slice %111 {offsets = [0, 0], sizes = [8, 32], strides = [1, 1]} : vector<8x96xf32> to vector<8x32xf32>
    %115 = vector.extract_strided_slice %111 {offsets = [0, 32], sizes = [8, 32], strides = [1, 1]} : vector<8x96xf32> to vector<8x32xf32>
    %116 = vector.extract_strided_slice %111 {offsets = [0, 64], sizes = [8, 32], strides = [1, 1]} : vector<8x96xf32> to vector<8x32xf32>
    %117 = arith.mulf %115, %81 : vector<8x32xf32>
    %118 = arith.mulf %114, %113 : vector<8x32xf32>
    %119 = arith.addf %117, %118 : vector<8x32xf32>
    %120 = math.tanh %119 : vector<8x32xf32>
    %121 = arith.mulf %116, %120 : vector<8x32xf32>
    %122 = tpu.concatenate %121, %102 in 1 : vector<8x32xf32>, vector<8x32xf32> -> vector<8x64xf32>
    %cst_35 = arith.constant dense<0.000000e+00> : vector<8x128xf32>
    %123 = tpu.matmul %122, %15, %cst_35 {dimension_numbers = #tpu.dot_dimension_numbers<[1], [0], [0], [1], [0, 0, 1, 1], [], []>} : vector<8x64xf32>, vector<64x128xf32>, vector<8x128xf32> -> vector<8x128xf32>
    %124 = arith.addf %123, %18 : vector<8x128xf32>
    %125 = vector.extract_strided_slice %124 {offsets = [0, 0], sizes = [8, 96], strides = [1, 1]} : vector<8x128xf32> to vector<8x96xf32>
    %126 = arith.negf %125 : vector<8x96xf32>
    %127 = math.exp %126 : vector<8x96xf32>
    %cst_36 = arith.constant 1.000000e+00 : f32
    %128 = vector.broadcast %cst_36 : f32 to vector<8x96xf32>
    %129 = arith.addf %128, %127 : vector<8x96xf32>
    %130 = arith.divf %128, %129 : vector<8x96xf32>
    %131 = vector.extract_strided_slice %124 {offsets = [0, 96], sizes = [8, 32], strides = [1, 1]} : vector<8x128xf32> to vector<8x32xf32>
    %132 = math.tanh %131 : vector<8x32xf32>
    %133 = vector.extract_strided_slice %130 {offsets = [0, 0], sizes = [8, 32], strides = [1, 1]} : vector<8x96xf32> to vector<8x32xf32>
    %134 = vector.extract_strided_slice %130 {offsets = [0, 32], sizes = [8, 32], strides = [1, 1]} : vector<8x96xf32> to vector<8x32xf32>
    %135 = vector.extract_strided_slice %130 {offsets = [0, 64], sizes = [8, 32], strides = [1, 1]} : vector<8x96xf32> to vector<8x32xf32>
    %136 = arith.mulf %134, %100 : vector<8x32xf32>
    %137 = arith.mulf %133, %132 : vector<8x32xf32>
    %138 = arith.addf %136, %137 : vector<8x32xf32>
    %139 = math.tanh %138 : vector<8x32xf32>
    %140 = arith.mulf %135, %139 : vector<8x32xf32>
    %141 = vector.extract_strided_slice %13 {offsets = [24, 0], sizes = [8, 128], strides = [1, 1]} : vector<64x128xf32> to vector<8x128xf32>
    %cst_37 = arith.constant dense<0.000000e+00> : vector<8x128xf32>
    %142 = tpu.matmul %121, %14, %cst_37 {dimension_numbers = #tpu.dot_dimension_numbers<[1], [0], [0], [1], [0, 0, 1, 1], [], []>} : vector<8x32xf32>, vector<32x128xf32>, vector<8x128xf32> -> vector<8x128xf32>
    %143 = arith.addf %141, %142 : vector<8x128xf32>
    %144 = vector.extract_strided_slice %143 {offsets = [0, 0], sizes = [8, 96], strides = [1, 1]} : vector<8x128xf32> to vector<8x96xf32>
    %145 = arith.negf %144 : vector<8x96xf32>
    %146 = math.exp %145 : vector<8x96xf32>
    %cst_38 = arith.constant 1.000000e+00 : f32
    %147 = vector.broadcast %cst_38 : f32 to vector<8x96xf32>
    %148 = arith.addf %147, %146 : vector<8x96xf32>
    %149 = arith.divf %147, %148 : vector<8x96xf32>
    %150 = vector.extract_strided_slice %143 {offsets = [0, 96], sizes = [8, 32], strides = [1, 1]} : vector<8x128xf32> to vector<8x32xf32>
    %151 = math.tanh %150 : vector<8x32xf32>
    %152 = vector.extract_strided_slice %149 {offsets = [0, 0], sizes = [8, 32], strides = [1, 1]} : vector<8x96xf32> to vector<8x32xf32>
    %153 = vector.extract_strided_slice %149 {offsets = [0, 32], sizes = [8, 32], strides = [1, 1]} : vector<8x96xf32> to vector<8x32xf32>
    %154 = vector.extract_strided_slice %149 {offsets = [0, 64], sizes = [8, 32], strides = [1, 1]} : vector<8x96xf32> to vector<8x32xf32>
    %155 = arith.mulf %153, %119 : vector<8x32xf32>
    %156 = arith.mulf %152, %151 : vector<8x32xf32>
    %157 = arith.addf %155, %156 : vector<8x32xf32>
    %158 = math.tanh %157 : vector<8x32xf32>
    %159 = arith.mulf %154, %158 : vector<8x32xf32>
    %160 = tpu.concatenate %159, %140 in 1 : vector<8x32xf32>, vector<8x32xf32> -> vector<8x64xf32>
    %cst_39 = arith.constant dense<0.000000e+00> : vector<8x128xf32>
    %161 = tpu.matmul %160, %15, %cst_39 {dimension_numbers = #tpu.dot_dimension_numbers<[1], [0], [0], [1], [0, 0, 1, 1], [], []>} : vector<8x64xf32>, vector<64x128xf32>, vector<8x128xf32> -> vector<8x128xf32>
    %162 = arith.addf %161, %18 : vector<8x128xf32>
    %163 = vector.extract_strided_slice %162 {offsets = [0, 0], sizes = [8, 96], strides = [1, 1]} : vector<8x128xf32> to vector<8x96xf32>
    %164 = arith.negf %163 : vector<8x96xf32>
    %165 = math.exp %164 : vector<8x96xf32>
    %cst_40 = arith.constant 1.000000e+00 : f32
    %166 = vector.broadcast %cst_40 : f32 to vector<8x96xf32>
    %167 = arith.addf %166, %165 : vector<8x96xf32>
    %168 = arith.divf %166, %167 : vector<8x96xf32>
    %169 = vector.extract_strided_slice %162 {offsets = [0, 96], sizes = [8, 32], strides = [1, 1]} : vector<8x128xf32> to vector<8x32xf32>
    %170 = math.tanh %169 : vector<8x32xf32>
    %171 = vector.extract_strided_slice %168 {offsets = [0, 0], sizes = [8, 32], strides = [1, 1]} : vector<8x96xf32> to vector<8x32xf32>
    %172 = vector.extract_strided_slice %168 {offsets = [0, 32], sizes = [8, 32], strides = [1, 1]} : vector<8x96xf32> to vector<8x32xf32>
    %173 = vector.extract_strided_slice %168 {offsets = [0, 64], sizes = [8, 32], strides = [1, 1]} : vector<8x96xf32> to vector<8x32xf32>
    %174 = arith.mulf %172, %138 : vector<8x32xf32>
    %175 = arith.mulf %171, %170 : vector<8x32xf32>
    %176 = arith.addf %174, %175 : vector<8x32xf32>
    %177 = math.tanh %176 : vector<8x32xf32>
    %178 = arith.mulf %173, %177 : vector<8x32xf32>
    %179 = vector.extract_strided_slice %13 {offsets = [32, 0], sizes = [8, 128], strides = [1, 1]} : vector<64x128xf32> to vector<8x128xf32>
    %cst_41 = arith.constant dense<0.000000e+00> : vector<8x128xf32>
    %180 = tpu.matmul %159, %14, %cst_41 {dimension_numbers = #tpu.dot_dimension_numbers<[1], [0], [0], [1], [0, 0, 1, 1], [], []>} : vector<8x32xf32>, vector<32x128xf32>, vector<8x128xf32> -> vector<8x128xf32>
    %181 = arith.addf %179, %180 : vector<8x128xf32>
    %182 = vector.extract_strided_slice %181 {offsets = [0, 0], sizes = [8, 96], strides = [1, 1]} : vector<8x128xf32> to vector<8x96xf32>
    %183 = arith.negf %182 : vector<8x96xf32>
    %184 = math.exp %183 : vector<8x96xf32>
    %cst_42 = arith.constant 1.000000e+00 : f32
    %185 = vector.broadcast %cst_42 : f32 to vector<8x96xf32>
    %186 = arith.addf %185, %184 : vector<8x96xf32>
    %187 = arith.divf %185, %186 : vector<8x96xf32>
    %188 = vector.extract_strided_slice %181 {offsets = [0, 96], sizes = [8, 32], strides = [1, 1]} : vector<8x128xf32> to vector<8x32xf32>
    %189 = math.tanh %188 : vector<8x32xf32>
    %190 = vector.extract_strided_slice %187 {offsets = [0, 0], sizes = [8, 32], strides = [1, 1]} : vector<8x96xf32> to vector<8x32xf32>
    %191 = vector.extract_strided_slice %187 {offsets = [0, 32], sizes = [8, 32], strides = [1, 1]} : vector<8x96xf32> to vector<8x32xf32>
    %192 = vector.extract_strided_slice %187 {offsets = [0, 64], sizes = [8, 32], strides = [1, 1]} : vector<8x96xf32> to vector<8x32xf32>
    %193 = arith.mulf %191, %157 : vector<8x32xf32>
    %194 = arith.mulf %190, %189 : vector<8x32xf32>
    %195 = arith.addf %193, %194 : vector<8x32xf32>
    %196 = math.tanh %195 : vector<8x32xf32>
    %197 = arith.mulf %192, %196 : vector<8x32xf32>
    %198 = tpu.concatenate %197, %178 in 1 : vector<8x32xf32>, vector<8x32xf32> -> vector<8x64xf32>
    %cst_43 = arith.constant dense<0.000000e+00> : vector<8x128xf32>
    %199 = tpu.matmul %198, %15, %cst_43 {dimension_numbers = #tpu.dot_dimension_numbers<[1], [0], [0], [1], [0, 0, 1, 1], [], []>} : vector<8x64xf32>, vector<64x128xf32>, vector<8x128xf32> -> vector<8x128xf32>
    %200 = arith.addf %199, %18 : vector<8x128xf32>
    %201 = vector.extract_strided_slice %200 {offsets = [0, 0], sizes = [8, 96], strides = [1, 1]} : vector<8x128xf32> to vector<8x96xf32>
    %202 = arith.negf %201 : vector<8x96xf32>
    %203 = math.exp %202 : vector<8x96xf32>
    %cst_44 = arith.constant 1.000000e+00 : f32
    %204 = vector.broadcast %cst_44 : f32 to vector<8x96xf32>
    %205 = arith.addf %204, %203 : vector<8x96xf32>
    %206 = arith.divf %204, %205 : vector<8x96xf32>
    %207 = vector.extract_strided_slice %200 {offsets = [0, 96], sizes = [8, 32], strides = [1, 1]} : vector<8x128xf32> to vector<8x32xf32>
    %208 = math.tanh %207 : vector<8x32xf32>
    %209 = vector.extract_strided_slice %206 {offsets = [0, 0], sizes = [8, 32], strides = [1, 1]} : vector<8x96xf32> to vector<8x32xf32>
    %210 = vector.extract_strided_slice %206 {offsets = [0, 32], sizes = [8, 32], strides = [1, 1]} : vector<8x96xf32> to vector<8x32xf32>
    %211 = vector.extract_strided_slice %206 {offsets = [0, 64], sizes = [8, 32], strides = [1, 1]} : vector<8x96xf32> to vector<8x32xf32>
    %212 = arith.mulf %210, %176 : vector<8x32xf32>
    %213 = arith.mulf %209, %208 : vector<8x32xf32>
    %214 = arith.addf %212, %213 : vector<8x32xf32>
    %215 = math.tanh %214 : vector<8x32xf32>
    %216 = arith.mulf %211, %215 : vector<8x32xf32>
    %217 = vector.extract_strided_slice %13 {offsets = [40, 0], sizes = [8, 128], strides = [1, 1]} : vector<64x128xf32> to vector<8x128xf32>
    %cst_45 = arith.constant dense<0.000000e+00> : vector<8x128xf32>
    %218 = tpu.matmul %197, %14, %cst_45 {dimension_numbers = #tpu.dot_dimension_numbers<[1], [0], [0], [1], [0, 0, 1, 1], [], []>} : vector<8x32xf32>, vector<32x128xf32>, vector<8x128xf32> -> vector<8x128xf32>
    %219 = arith.addf %217, %218 : vector<8x128xf32>
    %220 = vector.extract_strided_slice %219 {offsets = [0, 0], sizes = [8, 96], strides = [1, 1]} : vector<8x128xf32> to vector<8x96xf32>
    %221 = arith.negf %220 : vector<8x96xf32>
    %222 = math.exp %221 : vector<8x96xf32>
    %cst_46 = arith.constant 1.000000e+00 : f32
    %223 = vector.broadcast %cst_46 : f32 to vector<8x96xf32>
    %224 = arith.addf %223, %222 : vector<8x96xf32>
    %225 = arith.divf %223, %224 : vector<8x96xf32>
    %226 = vector.extract_strided_slice %219 {offsets = [0, 96], sizes = [8, 32], strides = [1, 1]} : vector<8x128xf32> to vector<8x32xf32>
    %227 = math.tanh %226 : vector<8x32xf32>
    %228 = vector.extract_strided_slice %225 {offsets = [0, 0], sizes = [8, 32], strides = [1, 1]} : vector<8x96xf32> to vector<8x32xf32>
    %229 = vector.extract_strided_slice %225 {offsets = [0, 32], sizes = [8, 32], strides = [1, 1]} : vector<8x96xf32> to vector<8x32xf32>
    %230 = vector.extract_strided_slice %225 {offsets = [0, 64], sizes = [8, 32], strides = [1, 1]} : vector<8x96xf32> to vector<8x32xf32>
    %231 = arith.mulf %229, %195 : vector<8x32xf32>
    %232 = arith.mulf %228, %227 : vector<8x32xf32>
    %233 = arith.addf %231, %232 : vector<8x32xf32>
    %234 = math.tanh %233 : vector<8x32xf32>
    %235 = arith.mulf %230, %234 : vector<8x32xf32>
    %236 = tpu.concatenate %235, %216 in 1 : vector<8x32xf32>, vector<8x32xf32> -> vector<8x64xf32>
    %cst_47 = arith.constant dense<0.000000e+00> : vector<8x128xf32>
    %237 = tpu.matmul %236, %15, %cst_47 {dimension_numbers = #tpu.dot_dimension_numbers<[1], [0], [0], [1], [0, 0, 1, 1], [], []>} : vector<8x64xf32>, vector<64x128xf32>, vector<8x128xf32> -> vector<8x128xf32>
    %238 = arith.addf %237, %18 : vector<8x128xf32>
    %239 = vector.extract_strided_slice %238 {offsets = [0, 0], sizes = [8, 96], strides = [1, 1]} : vector<8x128xf32> to vector<8x96xf32>
    %240 = arith.negf %239 : vector<8x96xf32>
    %241 = math.exp %240 : vector<8x96xf32>
    %cst_48 = arith.constant 1.000000e+00 : f32
    %242 = vector.broadcast %cst_48 : f32 to vector<8x96xf32>
    %243 = arith.addf %242, %241 : vector<8x96xf32>
    %244 = arith.divf %242, %243 : vector<8x96xf32>
    %245 = vector.extract_strided_slice %238 {offsets = [0, 96], sizes = [8, 32], strides = [1, 1]} : vector<8x128xf32> to vector<8x32xf32>
    %246 = math.tanh %245 : vector<8x32xf32>
    %247 = vector.extract_strided_slice %244 {offsets = [0, 0], sizes = [8, 32], strides = [1, 1]} : vector<8x96xf32> to vector<8x32xf32>
    %248 = vector.extract_strided_slice %244 {offsets = [0, 32], sizes = [8, 32], strides = [1, 1]} : vector<8x96xf32> to vector<8x32xf32>
    %249 = vector.extract_strided_slice %244 {offsets = [0, 64], sizes = [8, 32], strides = [1, 1]} : vector<8x96xf32> to vector<8x32xf32>
    %250 = arith.mulf %248, %214 : vector<8x32xf32>
    %251 = arith.mulf %247, %246 : vector<8x32xf32>
    %252 = arith.addf %250, %251 : vector<8x32xf32>
    %253 = math.tanh %252 : vector<8x32xf32>
    %254 = arith.mulf %249, %253 : vector<8x32xf32>
    %255 = vector.extract_strided_slice %13 {offsets = [48, 0], sizes = [8, 128], strides = [1, 1]} : vector<64x128xf32> to vector<8x128xf32>
    %cst_49 = arith.constant dense<0.000000e+00> : vector<8x128xf32>
    %256 = tpu.matmul %235, %14, %cst_49 {dimension_numbers = #tpu.dot_dimension_numbers<[1], [0], [0], [1], [0, 0, 1, 1], [], []>} : vector<8x32xf32>, vector<32x128xf32>, vector<8x128xf32> -> vector<8x128xf32>
    %257 = arith.addf %255, %256 : vector<8x128xf32>
    %258 = vector.extract_strided_slice %257 {offsets = [0, 0], sizes = [8, 96], strides = [1, 1]} : vector<8x128xf32> to vector<8x96xf32>
    %259 = arith.negf %258 : vector<8x96xf32>
    %260 = math.exp %259 : vector<8x96xf32>
    %cst_50 = arith.constant 1.000000e+00 : f32
    %261 = vector.broadcast %cst_50 : f32 to vector<8x96xf32>
    %262 = arith.addf %261, %260 : vector<8x96xf32>
    %263 = arith.divf %261, %262 : vector<8x96xf32>
    %264 = vector.extract_strided_slice %257 {offsets = [0, 96], sizes = [8, 32], strides = [1, 1]} : vector<8x128xf32> to vector<8x32xf32>
    %265 = math.tanh %264 : vector<8x32xf32>
    %266 = vector.extract_strided_slice %263 {offsets = [0, 0], sizes = [8, 32], strides = [1, 1]} : vector<8x96xf32> to vector<8x32xf32>
    %267 = vector.extract_strided_slice %263 {offsets = [0, 32], sizes = [8, 32], strides = [1, 1]} : vector<8x96xf32> to vector<8x32xf32>
    %268 = vector.extract_strided_slice %263 {offsets = [0, 64], sizes = [8, 32], strides = [1, 1]} : vector<8x96xf32> to vector<8x32xf32>
    %269 = arith.mulf %267, %233 : vector<8x32xf32>
    %270 = arith.mulf %266, %265 : vector<8x32xf32>
    %271 = arith.addf %269, %270 : vector<8x32xf32>
    %272 = math.tanh %271 : vector<8x32xf32>
    %273 = arith.mulf %268, %272 : vector<8x32xf32>
    %274 = tpu.concatenate %273, %254 in 1 : vector<8x32xf32>, vector<8x32xf32> -> vector<8x64xf32>
    %cst_51 = arith.constant dense<0.000000e+00> : vector<8x128xf32>
    %275 = tpu.matmul %274, %15, %cst_51 {dimension_numbers = #tpu.dot_dimension_numbers<[1], [0], [0], [1], [0, 0, 1, 1], [], []>} : vector<8x64xf32>, vector<64x128xf32>, vector<8x128xf32> -> vector<8x128xf32>
    %276 = arith.addf %275, %18 : vector<8x128xf32>
    %277 = vector.extract_strided_slice %276 {offsets = [0, 0], sizes = [8, 96], strides = [1, 1]} : vector<8x128xf32> to vector<8x96xf32>
    %278 = arith.negf %277 : vector<8x96xf32>
    %279 = math.exp %278 : vector<8x96xf32>
    %cst_52 = arith.constant 1.000000e+00 : f32
    %280 = vector.broadcast %cst_52 : f32 to vector<8x96xf32>
    %281 = arith.addf %280, %279 : vector<8x96xf32>
    %282 = arith.divf %280, %281 : vector<8x96xf32>
    %283 = vector.extract_strided_slice %276 {offsets = [0, 96], sizes = [8, 32], strides = [1, 1]} : vector<8x128xf32> to vector<8x32xf32>
    %284 = math.tanh %283 : vector<8x32xf32>
    %285 = vector.extract_strided_slice %282 {offsets = [0, 0], sizes = [8, 32], strides = [1, 1]} : vector<8x96xf32> to vector<8x32xf32>
    %286 = vector.extract_strided_slice %282 {offsets = [0, 32], sizes = [8, 32], strides = [1, 1]} : vector<8x96xf32> to vector<8x32xf32>
    %287 = vector.extract_strided_slice %282 {offsets = [0, 64], sizes = [8, 32], strides = [1, 1]} : vector<8x96xf32> to vector<8x32xf32>
    %288 = arith.mulf %286, %252 : vector<8x32xf32>
    %289 = arith.mulf %285, %284 : vector<8x32xf32>
    %290 = arith.addf %288, %289 : vector<8x32xf32>
    %291 = math.tanh %290 : vector<8x32xf32>
    %292 = arith.mulf %287, %291 : vector<8x32xf32>
    %293 = vector.extract_strided_slice %13 {offsets = [56, 0], sizes = [8, 128], strides = [1, 1]} : vector<64x128xf32> to vector<8x128xf32>
    %cst_53 = arith.constant dense<0.000000e+00> : vector<8x128xf32>
    %294 = tpu.matmul %273, %14, %cst_53 {dimension_numbers = #tpu.dot_dimension_numbers<[1], [0], [0], [1], [0, 0, 1, 1], [], []>} : vector<8x32xf32>, vector<32x128xf32>, vector<8x128xf32> -> vector<8x128xf32>
    %295 = arith.addf %293, %294 : vector<8x128xf32>
    %296 = vector.extract_strided_slice %295 {offsets = [0, 0], sizes = [8, 96], strides = [1, 1]} : vector<8x128xf32> to vector<8x96xf32>
    %297 = arith.negf %296 : vector<8x96xf32>
    %298 = math.exp %297 : vector<8x96xf32>
    %cst_54 = arith.constant 1.000000e+00 : f32
    %299 = vector.broadcast %cst_54 : f32 to vector<8x96xf32>
    %300 = arith.addf %299, %298 : vector<8x96xf32>
    %301 = arith.divf %299, %300 : vector<8x96xf32>
    %302 = vector.extract_strided_slice %295 {offsets = [0, 96], sizes = [8, 32], strides = [1, 1]} : vector<8x128xf32> to vector<8x32xf32>
    %303 = math.tanh %302 : vector<8x32xf32>
    %304 = vector.extract_strided_slice %301 {offsets = [0, 0], sizes = [8, 32], strides = [1, 1]} : vector<8x96xf32> to vector<8x32xf32>
    %305 = vector.extract_strided_slice %301 {offsets = [0, 32], sizes = [8, 32], strides = [1, 1]} : vector<8x96xf32> to vector<8x32xf32>
    %306 = vector.extract_strided_slice %301 {offsets = [0, 64], sizes = [8, 32], strides = [1, 1]} : vector<8x96xf32> to vector<8x32xf32>
    %307 = arith.mulf %305, %271 : vector<8x32xf32>
    %308 = arith.mulf %304, %303 : vector<8x32xf32>
    %309 = arith.addf %307, %308 : vector<8x32xf32>
    %310 = math.tanh %309 : vector<8x32xf32>
    %311 = arith.mulf %306, %310 : vector<8x32xf32>
    %312 = tpu.concatenate %311, %292 in 1 : vector<8x32xf32>, vector<8x32xf32> -> vector<8x64xf32>
    %cst_55 = arith.constant dense<0.000000e+00> : vector<8x128xf32>
    %313 = tpu.matmul %312, %15, %cst_55 {dimension_numbers = #tpu.dot_dimension_numbers<[1], [0], [0], [1], [0, 0, 1, 1], [], []>} : vector<8x64xf32>, vector<64x128xf32>, vector<8x128xf32> -> vector<8x128xf32>
    %314 = arith.addf %313, %18 : vector<8x128xf32>
    %315 = vector.extract_strided_slice %314 {offsets = [0, 0], sizes = [8, 96], strides = [1, 1]} : vector<8x128xf32> to vector<8x96xf32>
    %316 = arith.negf %315 : vector<8x96xf32>
    %317 = math.exp %316 : vector<8x96xf32>
    %cst_56 = arith.constant 1.000000e+00 : f32
    %318 = vector.broadcast %cst_56 : f32 to vector<8x96xf32>
    %319 = arith.addf %318, %317 : vector<8x96xf32>
    %320 = arith.divf %318, %319 : vector<8x96xf32>
    %321 = vector.extract_strided_slice %314 {offsets = [0, 96], sizes = [8, 32], strides = [1, 1]} : vector<8x128xf32> to vector<8x32xf32>
    %322 = math.tanh %321 : vector<8x32xf32>
    %323 = vector.extract_strided_slice %320 {offsets = [0, 0], sizes = [8, 32], strides = [1, 1]} : vector<8x96xf32> to vector<8x32xf32>
    %324 = vector.extract_strided_slice %320 {offsets = [0, 32], sizes = [8, 32], strides = [1, 1]} : vector<8x96xf32> to vector<8x32xf32>
    %325 = vector.extract_strided_slice %320 {offsets = [0, 64], sizes = [8, 32], strides = [1, 1]} : vector<8x96xf32> to vector<8x32xf32>
    %326 = arith.mulf %324, %290 : vector<8x32xf32>
    %327 = arith.mulf %323, %322 : vector<8x32xf32>
    %328 = arith.addf %326, %327 : vector<8x32xf32>
    %329 = math.tanh %328 : vector<8x32xf32>
    %330 = arith.mulf %325, %329 : vector<8x32xf32>
    %c0_57 = arith.constant 0 : index
    %c0_58 = arith.constant 0 : index
    %331 = vector.load %arg9[%c0_57, %c0_58] : memref<32x128xf32, #tpu.memory_space<vmem>>, vector<32x128xf32>
    %cst_59 = arith.constant dense<0.000000e+00> : vector<8x128xf32>
    %332 = tpu.matmul %330, %331, %cst_59 {dimension_numbers = #tpu.dot_dimension_numbers<[1], [0], [0], [1], [0, 0, 1, 1], [], []>} : vector<8x32xf32>, vector<32x128xf32>, vector<8x128xf32> -> vector<8x128xf32>
    %c0_60 = arith.constant 0 : index
    %c0_61 = arith.constant 0 : index
    %333 = vector.load %arg10[%c0_60, %c0_61] : memref<1x128xf32, #tpu.memory_space<vmem>>, vector<1x128xf32>
    %334 = vector.broadcast %333 : vector<1x128xf32> to vector<8x128xf32>
    %335 = arith.addf %332, %334 : vector<8x128xf32>
    %c0_62 = arith.constant 0 : index
    %c0_63 = arith.constant 0 : index
    %336 = vector.load %arg11[%c0_62, %c0_63] : memref<8x128xf32, #tpu.memory_space<vmem>>, vector<8x128xf32>
    tpu.vector_store %arg11[%c0_62, %c0_63], %335 {strides = array<i32>} : memref<8x128xf32, #tpu.memory_space<vmem>>, vector<8x128xf32>,
    return
  }
}

</mosaic_0001>

<bundles_post_ra>
// kernel: rnn_classifier_forward.1
= control target key start
LH: loop header
LB: loop body
LE: loop exit
PB: predicated region body
PF: predicated region fallthrough
CT: control target
= control target key end

     0   :  { %v2936_v0 = vmov 0.0|0.0   ;;  %vm2937_vm0 = vmmov 0   ;;  %v2938_v4 = vmov 0.0   ;;  %v2939_v7 = vmov 0   ;;  %s3494_s2 = inlined_call_operand.vmem [shape: f32[32,128], index: 2, kind: input, shape index: {}]   ;;  %s3495_s0 = inlined_call_operand.vmem [shape: s32[64,1], index: 0, kind: input, shape index: {}]   ;;  %s3496_s1 = inlined_call_operand.vmem [shape: f32[50,32], index: 1, kind: input, shape index: {}]   ;;  %s3497_s8 = inlined_call_operand.vmem [shape: f32[2,8,32], index: 8, kind: input, shape index: {}]   ;;  %s3498_s3 = inlined_call_operand.vmem [shape: f32[32,128], index: 3, kind: input, shape index: {}]   ;;  %s3499_s7 = inlined_call_operand.vmem [shape: f32[2,8,32], index: 7, kind: input, shape index: {}]   ;;  %s3500_s4 = inlined_call_operand.vmem [shape: f32[1,128], index: 4, kind: input, shape index: {}]   ;;  %s3501_s5 = inlined_call_operand.vmem [shape: f32[64,128], index: 5, kind: input, shape index: {}]   ;;  %s3502_s6 = inlined_call_operand.vmem [shape: f32[1,128], index: 6, kind: input, shape index: {}]   ;;  %s3503_s9 = inlined_call_operand.vmem [shape: f32[32,128], index: 9, kind: input, shape index: {}]   ;;  %s3504_s10 = inlined_call_operand.vmem [shape: f32[1,128], index: 10, kind: input, shape index: {}]   ;;  %s3505_s11 = inlined_call_operand.vmem [shape: f32[8,128], index: 11, kind: output, shape index: {}]  }
   0x1   :  { %2631 = vmatprep.subr.bf16.mxu0 %v2936_v0  ;;  %v103_v1 = vld [vmem:[%s3494_s2] sm:$0xff]  ;;  %v104_v2 = vld [vmem:[%s3494_s2 + $0x8] sm:$0xff]  ;;  %v105_v3 = vld [vmem:[%s3494_s2 + $0x10] sm:$0xff]  ;;  %2333 = vmatprep.mubr.msk.f32.mxu0 %vm2937_vm0, %v2938_v4  ;;  %vm107_vm1 = vcmask 261120   ;;  %v46_v24 = vlaneseq  ;;  %vm236_vm2 = vcmask 408576   ;;  %vm261_vm4 = vcmask 1041408  }
   0x2   :  { %v2632_v5 = vpack.c.bf16 %v104_v2, %v103_v1  ;;  %v106_v6 = vld [vmem:[%s3494_s2 + $0x18] sm:$0xff]  ;;  %2806 = vset.pattern.permute.xlu0 %v2939_v7  ;;  %2807 = vset.pattern.permute.xlu1 %v2939_v7  ;;  %v38_v9 = vld [vmem:[%s3495_s0] sm:$0xff]  ;;  %v40_v10 = vld [vmem:[%s3495_s0 + $0x10] sm:$0xff]  ;;  %vm506_vm12 = vcmask 523264  }
   0x3   :  { %v2635_v8 = vpack.c.bf16 %v106_v6, %v105_v3  ;;  %49 = vperm.xlu0 %2806, %v38_v9   ;;  %55 = vperm.xlu1 %2807, %v40_v10   ;;  %v39_v11 = vld [vmem:[%s3495_s0 + $0x8] sm:$0xff]  ;;  %v41_v12 = vld [vmem:[%s3495_s0 + $0x18] sm:$0xff]  ;;  %v96_v13 = vld [vmem:[%s3496_s1] sm:$0xff]  ;;  %v3086_v25 = vand.u32 127, %v46_v24 }
   0x4   :  { %2633 = vmatpush3.bf16.msra.mxu0 %v2632_v5  ;;  %v42_v14 = vld [vmem:[%s3495_s0 + $0x20] sm:$0xff]  ;;  %v43_v15 = vld [vmem:[%s3495_s0 + $0x28] sm:$0xff]  ;;  %v44_v17 = vld [vmem:[%s3495_s0 + $0x30] sm:$0xff] }
   0x5   :  { %2634 = vmatprep.subr.bf16.mxu0 %v2936_v0  ;;  %v97_v16 = vld [vmem:[%s3496_s1 + $0x8] sm:$0xff]  ;;  %v45_v18 = vld [vmem:[%s3495_s0 + $0x38] sm:$0xff]  ;;  %v98_v19 = vld [vmem:[%s3496_s1 + $0x10] sm:$0xff] }
   0x6   :  { %v99_v20 = vld [vmem:[%s3496_s1 + $0x18] sm:$0xff]  ;;  %v100_v21 = vld [vmem:[%s3496_s1 + $0x20] sm:$0xff]  ;;  %v101_v22 = vld [vmem:[%s3496_s1 + $0x28] sm:$0xff] }
   0x7   :  { %52 = vperm.xlu0 %2806, %v39_v11   ;;  %58 = vperm.xlu1 %2807, %v41_v12   ;;  %v102_v23 = vld [vmem:[%s3496_s1 + $0x30] sm:$0x3]  ;;  %v392_v28 = vld [vmem:[%s3497_s8] sm:$0xff]  ;;  %s2940_s1 = smov 32   ;;  %v371_v48 = vld [vmem:[%s3498_s3 + $0x8] sm:$0xff] }
   0x8   :  { %2636 = vmatpush3.bf16.msra.mxu0 %v2635_v8  ;;  %v370_v47 = vld [vmem:[%s3498_s3] sm:$0xff]  ;;  %v372_v54 = vld [vmem:[%s3498_s3 + $0x10] sm:$0xff]  ;;  %v373_v55 = vld [vmem:[%s3498_s3 + $0x18] sm:$0xff] }
   0x9   :  { %2655 = vmatprep.subr.bf16.mxu0 %v2936_v0  ;;  %v3104_v52 = vpack.c.bf16 %v371_v48, %v370_v47  ;;  %v3121_v58 = vpack.c.bf16 %v373_v55, %v372_v54  ;;  %v389_v3 = vld [vmem:[%s3499_s7] sm:$0xff]  ;;  %v2146_v48 = vld [vmem:[%s3499_s7 + $0x8] sm:$0xff] }
   0xa   :  { %v2135_v5 = vld [vmem:[%s3500_s4] ss:$0 sm:$0xff] }
   0xb   :  { %2334 = vmatmul.mubr.msk.f32.vlgmr.msra.gmra.mrb[0].mxu0 %vm107_vm1, %v96_v13  ;;  %61 = vperm.xlu0 %2806, %v42_v14  }
   0xc   :  { %2336 = vmatprep.mubr.msk.f32.mxu0 %vm2937_vm0, %v2938_v4  ;;  %64 = vperm.xlu1 %2807, %v43_v15  }
   0xf   :  { %2337 = vmatmul.mubr.msk.f32.gmra.mrb[2].mxu0 %vm107_vm1, %v97_v16  ;;  %67 = vperm.xlu0 %2806, %v44_v17  }
  0x10   :  { %2339 = vmatprep.mubr.msk.f32.mxu0 %vm2937_vm0, %v2938_v4  ;;  %70 = vperm.xlu1 %2807, %v45_v18  }
  0x13   :  { %2340 = vmatmul.mubr.msk.f32.gmra.mrb[4].mxu0 %vm107_vm1, %v98_v19 }
  0x14   :  { %2342 = vmatprep.mubr.msk.f32.mxu0 %vm2937_vm0, %v2938_v4  ;;  %477 = vrot.lane.b32.xlu1 %v392_v28, %s2940_s1 }
  0x17   :  { %2343 = vmatmul.mubr.msk.f32.gmra.mrb[6].mxu0 %vm107_vm1, %v99_v20 }
  0x18   :  { %2345 = vmatprep.mubr.msk.f32.mxu0 %vm2937_vm0, %v2938_v4 }
  0x1b   :  { %2346 = vmatmul.mubr.msk.f32.gmra.mrb[8].mxu0 %vm107_vm1, %v100_v21 }
  0x1c   :  { %2348 = vmatprep.mubr.msk.f32.mxu0 %vm2937_vm0, %v2938_v4 }
  0x1f   :  { %2349 = vmatmul.mubr.msk.f32.gmra.mrb[10].mxu0 %vm107_vm1, %v101_v22 }
  0x20   :  { %2351 = vmatprep.mubr.msk.f32.mxu0 %vm2937_vm0, %v2938_v4 }
  0x23   :  { %2352 = vmatmul.mubr.msk.f32.gmra.mrb[12].mxu0 %vm107_vm1, %v102_v23 }
  0x24   :  { %2407 = vmatprep.mubr.msk.f32.mxu0 %vm2937_vm0, %v2938_v4 }
  0x82   :  { %v50_v26 = vpop.permute.xlu0 %49  ;;  %v56_v39 = vpop.permute.xlu1 %55 }
  0x83   :  { %vm72_vm3 = vcmp.eq.s32.totalorder %v50_v26, %v3086_v25  ;;  %vm74_vm5 = vcmp.eq.s32.totalorder %v56_v39, %v3086_v25 }
  0x84   :  { %v2120_v27 = vsel %vm72_vm3, 1.0, %v2938_v4  ;;  %v2122_v53 = vsel %vm74_vm5, 1.0, %v2938_v4 }
  0x85   :  { %2368 = vmatprep.mubr.msk.f32.mxu1 %vm236_vm2, %v2120_v27 }
  0x86   :  { %v53_v42 = vpop.permute.xlu0 %52  ;;  %v59_v46 = vpop.permute.xlu1 %58 }
  0x87   :  { %vm73_vm6 = vcmp.eq.s32.totalorder %v53_v42, %v3086_v25  ;;  %vm75_vm7 = vcmp.eq.s32.totalorder %v59_v46, %v3086_v25  ;;  %v378_v42 = vld [vmem:[%s3501_s5 + $0x20] sm:$0xff]  ;;  %v381_v46 = vld [vmem:[%s3501_s5 + $0x38] sm:$0xff] }
  0x88   :  { %v2121_v56 = vsel %vm73_vm6, 1.0, %v2938_v4  ;;  %v2123_v60 = vsel %vm75_vm7, 1.0, %v2938_v4 }
  0x8a   :  { %v62_v50 = vpop.permute.xlu0 %61 }
  0x8b   :  { %v65_v57 = vpop.permute.xlu1 %64  ;;  %vm76_vm8 = vcmp.eq.s32.totalorder %v62_v50, %v3086_v25 }
  0x8c   :  { %v2124_v61 = vsel %vm76_vm8, 1.0, %v2938_v4  ;;  %vm77_vm9 = vcmp.eq.s32.totalorder %v65_v57, %v3086_v25 }
  0x8d   :  { %v2125_v63 = vsel %vm77_vm9, 1.0, %v2938_v4 }
  0x8e   :  { %v68_v59 = vpop.permute.xlu0 %67 }
  0x8f   :  { %vm78_vm10 = vcmp.eq.s32.totalorder %v68_v59, %v3086_v25  ;;  %v71_v62 = vpop.permute.xlu1 %70 }
  0x90   :  { %v2126_v1 = vsel %vm78_vm10, 1.0, %v2938_v4  ;;  %vm79_vm11 = vcmp.eq.s32.totalorder %v71_v62, %v3086_v25 }
  0x91   :  { %v2127_v2 = vsel %vm79_vm11, 1.0, %v2938_v4 }
  0xde   :  { %v195_v29 = vpop.f32.mrb[0].mxu0 }
  0xdf   :  { %v2335_v30 = vpop.f32.mrb[1].mxu0 }
  0xe2   :  { %v200_v31 = vpop.f32.mrb[2].mxu0 }
  0xe3   :  { %v2637_v32 = vpack.c.bf16 %v200_v31, %v195_v29  ;;  %v2338_v33 = vpop.f32.mrb[3].mxu0 }
  0xe5   :  { %2638 = vmatprep.subr.bf16.mxu1 %v2637_v32 }
  0xe6   :  { %v205_v34 = vpop.f32.mrb[4].mxu0  ;;  %2640 = vmatpush3.bf16.msra.mxu1 %v2637_v32  ;;  %v478_v32 = vpop.permute.xlu1 %477 }
  0xe7   :  { %v2341_v35 = vpop.f32.mrb[5].mxu0 }
  0xea   :  { %v210_v36 = vpop.f32.mrb[6].mxu0 }
  0xeb   :  { %v2641_v37 = vpack.c.bf16 %v210_v36, %v205_v34  ;;  %v2344_v38 = vpop.f32.mrb[7].mxu0  ;;  %v374_v36 = vld [vmem:[%s3501_s5] sm:$0xff] }
  0xec   :  { %v376_v38 = vld [vmem:[%s3501_s5 + $0x10] sm:$0xff] }
  0xed   :  { %2642 = vmatprep.subr.bf16.mxu1 %v2641_v37 }
  0xee   :  { %v215_v40 = vpop.f32.mrb[8].mxu0  ;;  %2644 = vmatpush3.bf16.msra.mxu1 %v2641_v37  ;;  %v375_v37 = vld [vmem:[%s3501_s5 + $0x8] sm:$0xff] }
  0xef   :  { %v2347_v41 = vpop.f32.mrb[9].mxu0  ;;  %v3182_v39 = vpack.c.bf16 %v375_v37, %v374_v36 }
  0xf1   :  { %2657 = vmatpush3.bf16.msra.mxu0 %v3182_v39 }
  0xf2   :  { %v220_v43 = vpop.f32.mrb[10].mxu0  ;;  %2658 = vmatprep.subr.bf16.mxu0 %v2936_v0 }
  0xf3   :  { %v2645_v44 = vpack.c.bf16 %v220_v43, %v215_v40  ;;  %v2350_v45 = vpop.f32.mrb[11].mxu0  ;;  %v377_v40 = vld [vmem:[%s3501_s5 + $0x18] sm:$0xff]  ;;  %v379_v43 = vld [vmem:[%s3501_s5 + $0x28] sm:$0xff] }
  0xf4   :  { %v3188_v41 = vpack.c.bf16 %v377_v40, %v376_v38  ;;  %v380_v45 = vld [vmem:[%s3501_s5 + $0x30] sm:$0xff]  ;;  %s2941_s5 = smov 64  }
  0xf5   :  { %2646 = vmatprep.subr.bf16.mxu1 %v2645_v44 }
  0xf6   :  { %2648 = vmatpush3.bf16.msra.mxu1 %v2645_v44  ;;  %v225_v49 = vpop.f32.mrb[12].mxu0  ;;  %2660 = vmatpush3.bf16.msra.mxu0 %v3188_v41  ;;  %v3198_v44 = vpack.c.bf16 %v379_v43, %v378_v42 }
  0xf7   :  { %v2353_v51 = vpop.f32.mrb[13].mxu0  ;;  %2366 = vmatprep.subr.msk.mxu1 %vm261_vm4, %v225_v49  ;;  %2661 = vmatprep.subr.bf16.mxu0 %v2936_v0 }
  0xfa   :  { %2367 = vmatpush3.msk.msra.mxu1 %vm261_vm4, %v225_v49  ;;  %2663 = vmatpush3.bf16.msra.mxu0 %v3198_v44  ;;  %v3212_v49 = vpack.c.bf16 %v381_v46, %v380_v45 }
  0xfb   :  { %2369 = vmatmul.mubr.msk.f32.vlgmr.msra.gmra.mrb[0].mxu1 %vm236_vm2, %v2121_v56  ;;  %2649 = vmatprep.subr.bf16.mxu1 %v2936_v0  ;;  %v3241_v56 = vld [vmem:[%s3502_s6] ss:$0 sm:$0xff]  ;;  %s2942_s6 = smov 96  }
  0xfc   :  { %2371 = vmatprep.mubr.msk.f32.mxu1 %vm236_vm2, %v2122_v53  ;;  %2651 = vmatpush3.bf16.msra.mxu1 %v3104_v52 }
  0xfd   :  { %2652 = vmatprep.subr.bf16.mxu1 %v2936_v0  ;;  %2664 = vmatprep.subr.bf16.mxu0 %v2936_v0 }
  0xfe   :  { %2666 = vmatpush3.bf16.msra.mxu0 %v3212_v49 }
  0xff   :  { %2372 = vmatmul.mubr.msk.f32.gmra.mrb[2].mxu1 %vm236_vm2, %v2123_v60  ;;  %2673 = vmatprep.subr.bf16.mxu0 %v2936_v0 }
 0x100   :  { %2374 = vmatprep.mubr.msk.f32.mxu1 %vm236_vm2, %v2124_v61  ;;  %2654 = vmatpush3.bf16.msra.mxu1 %v3121_v58 }
 0x101   :  { %2667 = vmatprep.subr.bf16.mxu1 %v2936_v0 }
 0x103   :  { %2375 = vmatmul.mubr.msk.f32.gmra.mrb[4].mxu1 %vm236_vm2, %v2125_v63 }
 0x104   :  { %2377 = vmatprep.mubr.msk.f32.mxu1 %vm236_vm2, %v2126_v1 }
 0x107   :  { %2378 = vmatmul.mubr.msk.f32.gmra.mrb[6].mxu1 %vm236_vm2, %v2127_v2 }
 0x108   :  { %2388 = vmatprep.mubr.msk.f32.mxu1 %vm2937_vm0, %v2938_v4 }
 0x10b   :  { %2389 = vmatmul.mubr.msk.f32.vlgmr.msra.gmra.mrb[8].mxu1 %vm107_vm1, %v389_v3  ;;  %v2147_v3 = vld [vmem:[%s3497_s8 + $0x8] sm:$0xff] }
 0x10c   :  { %2669 = vmatpush3.bf16.msra.mxu1 %v3104_v52  ;;  %2418 = vmatprep.mubr.msk.f32.mxu1 %vm2937_vm0, %v2938_v4 }
 0x10d   :  { %2670 = vmatprep.subr.bf16.mxu1 %v2936_v0 }
 0x110   :  { %2672 = vmatpush3.bf16.msra.mxu1 %v3121_v58 }
 0x111   :  { %2685 = vmatprep.subr.bf16.mxu1 %v2936_v0 }
 0x1ce   :  { %v2370_v6 = vpop.f32.mrb[0].mxu1 }
 0x1cf   :  { %v3154_v7 = vadd.f32 %v2370_v6, %v2135_v5  ;;  %v331_v8 = vpop.f32.mrb[1].mxu1 }
 0x1d0   :  { %v332_v21 = vadd.f32 %v2135_v5, %v331_v8 }
 0x1d2   :  { %v2373_v9 = vpop.f32.mrb[2].mxu1 }
 0x1d3   :  { %v3156_v10 = vadd.f32 %v2373_v9, %v2135_v5  ;;  %v341_v11 = vpop.f32.mrb[3].mxu1 }
 0x1d4   :  { %v3158_v12 = vadd.f32 %v2135_v5, %v341_v11 }
 0x1d6   :  { %v2376_v13 = vpop.f32.mrb[4].mxu1 }
 0x1d7   :  { %v3160_v14 = vadd.f32 %v2376_v13, %v2135_v5  ;;  %v351_v15 = vpop.f32.mrb[5].mxu1 }
 0x1d8   :  { %v3162_v16 = vadd.f32 %v2135_v5, %v351_v15 }
 0x1da   :  { %v2379_v17 = vpop.f32.mrb[6].mxu1 }
 0x1db   :  { %v3164_v18 = vadd.f32 %v2379_v17, %v2135_v5  ;;  %v361_v19 = vpop.f32.mrb[7].mxu1 }
 0x1dc   :  { %v3166_v20 = vadd.f32 %v2135_v5, %v361_v19 }
 0x1de   :  { %v464_v22 = vpop.f32.mrb[8].mxu1 }
 0x1df   :  { %v468_v23 = vadd.f32 %v464_v22, %v332_v21  ;;  %v2390_v24 = vpop.f32.mrb[9].mxu1 }
 0x1e1   :  { %2808 = vtanh.f32 %v468_v23  ;;  %v2149_v26 = vmul.f32 -1.442695, %v468_v23 }
 0x1e3   :  { %2810 = vpow2.f32 %v2149_v26 }
 0x1eb   :  { %v2809_v25 = vpop.eup %2808 }
 0x1ec   :  { %482 = vrot.lane.b32.xlu0 %v2809_v25, %s2940_s1 }
 0x1ed   :  { %v2811_v27 = vpop.eup %2810 }
 0x1ee   :  { %v472_v28 = vadd.f32 1.0, %v2811_v27 }
 0x1f0   :  { %2812 = vrcp.f32 %v472_v28 }
 0x1fa   :  { %v2813_v29 = vpop.eup %2812 }
 0x1fb   :  { %v480_v33 = vmul.f32 %v2813_v29, %v478_v32 }
 0x25e   :  { %v483_v30 = vpop.permute.xlu0 %482 }
 0x25f   :  { %v485_v31 = vmul.f32 %v2813_v29, %v483_v30 }
 0x261   :  { %487 = vrot.lane.b32.xlu0 %v485_v31, %s2940_s1 }
 0x2d3   :  { %v488_v34 = vpop.permute.xlu0 %487 }
 0x2d4   :  { %v3170_v35 = vadd.f32 %v488_v34, %v480_v33 }
 0x2d6   :  { %2814 = vtanh.f32 %v3170_v35 }
 0x2e0   :  { %v2815_v47 = vpop.eup %2814 }
 0x2e1   :  { %493 = vrot.lane.b32.xlu1 %v2815_v47, %s2940_s1 }
 0x2e5   :  { %502 = vrot.lane.b32.xlu1 %v2146_v48, %s2940_s1 }
 0x353   :  { %v494_v50 = vpop.permute.xlu1 %493 }
 0x354   :  { %v496_v51 = vmul.f32 %v2813_v29, %v494_v50 }
 0x356   :  { %498 = vrot.lane.b32.xlu0 %v496_v51, %s2941_s5 }
 0x357   :  { %v503_v53 = vpop.permute.xlu1 %502 }
 0x3c8   :  { %v499_v54 = vpop.permute.xlu0 %498 }
 0x3c9   :  { %v505_v55 = vsel %vm107_vm1, %v499_v54, %v503_v53  ;;  %2419 = vmatmul.mubr.msk.f32.vlgmr.msra.gmra.mrb[10].mxu1 %vm107_vm1, %v499_v54 }
 0x3ca   :  { %2408 = vmatmul.mubr.msk.f32.vlgmr.msra.gmra.mrb[14].mxu0 %vm506_vm12, %v505_v55  ;;  %2687 = vmatpush3.bf16.msra.mxu1 %v3104_v52 }
 0x3cb   :  { %2675 = vmatpush3.bf16.msra.mxu0 %v3182_v39  ;;  %2688 = vmatprep.subr.bf16.mxu1 %v2936_v0 }
 0x3cc   :  { %2676 = vmatprep.subr.bf16.mxu0 %v2936_v0  ;;  %2448 = vmatprep.mubr.msk.f32.mxu1 %vm2937_vm0, %v2938_v4 }
 0x3cd   :  { %2437 = vmatprep.mubr.msk.f32.mxu0 %vm2937_vm0, %v2938_v4 }
 0x3ce   :  { %2690 = vmatpush3.bf16.msra.mxu1 %v3121_v58 }
 0x3cf   :  { %2678 = vmatpush3.bf16.msra.mxu0 %v3188_v41  ;;  %2691 = vmatprep.subr.bf16.mxu1 %v2936_v0 }
 0x3d0   :  { %2679 = vmatprep.subr.bf16.mxu0 %v2936_v0 }
 0x3d3   :  { %2681 = vmatpush3.bf16.msra.mxu0 %v3198_v44 }
 0x3d4   :  { %2682 = vmatprep.subr.bf16.mxu0 %v2936_v0 }
 0x3d7   :  { %2684 = vmatpush3.bf16.msra.mxu0 %v3212_v49 }
 0x3d8   :  { %2703 = vmatprep.subr.bf16.mxu0 %v2936_v0 }
 0x49c   :  { %v676_v57 = vpop.f32.mrb[10].mxu1 }
 0x49d   :  { %v680_v59 = vadd.f32 %v676_v57, %v3154_v7  ;;  %v576_v60 = vpop.f32.mrb[14].mxu0  ;;  %v2420_v61 = vpop.f32.mrb[11].mxu1 }
 0x49e   :  { %v577_v62 = vadd.f32 %v3241_v56, %v576_v60  ;;  %v2409_v63 = vpop.f32.mrb[15].mxu0 }
 0x49f   :  { %2816 = vtanh.f32 %v680_v59  ;;  %v2153_v5 = vmul.f32 -1.442695, %v680_v59 }
 0x4a0   :  { %2818 = vtanh.f32 %v577_v62  ;;  %v2151_v6 = vmul.f32 -1.442695, %v577_v62 }
 0x4a1   :  { %2820 = vpow2.f32 %v2153_v5 }
 0x4a2   :  { %2822 = vpow2.f32 %v2151_v6 }
 0x4a9   :  { %v2817_v1 = vpop.eup %2816 }
 0x4aa   :  { %v2819_v2 = vpop.eup %2818  ;;  %690 = vrot.lane.b32.xlu1 %v2817_v1, %s2940_s1 }
 0x4ab   :  { %593 = vrot.lane.b32.xlu0 %v2819_v2, %s2940_s1  ;;  %v2821_v7 = vpop.eup %2820 }
 0x4ac   :  { %v2823_v8 = vpop.eup %2822  ;;  %v684_v9 = vadd.f32 1.0, %v2821_v7 }
 0x4ad   :  { %v583_v11 = vadd.f32 1.0, %v2823_v8 }
 0x4ae   :  { %2824 = vrcp.f32 %v684_v9 }
 0x4af   :  { %588 = vrot.lane.b32.xlu0 %v2147_v3, %s2940_s1  ;;  %2826 = vrcp.f32 %v583_v11 }
 0x4b8   :  { %v2825_v13 = vpop.eup %2824 }
 0x4b9   :  { %v2827_v17 = vpop.eup %2826  ;;  %v688_v24 = vmul.f32 %v2825_v13, %v3170_v35 }
 0x51c   :  { %v691_v15 = vpop.permute.xlu1 %690 }
 0x51d   :  { %v693_v19 = vmul.f32 %v2825_v13, %v691_v15  ;;  %v594_v21 = vpop.permute.xlu0 %593 }
 0x51e   :  { %v596_v22 = vmul.f32 %v2827_v17, %v594_v21 }
 0x51f   :  { %695 = vrot.lane.b32.xlu0 %v693_v19, %s2940_s1 }
 0x520   :  { %598 = vrot.lane.b32.xlu1 %v596_v22, %s2940_s1 }
 0x521   :  { %v589_v23 = vpop.permute.xlu0 %588 }
 0x522   :  { %v591_v25 = vmul.f32 %v2827_v17, %v589_v23 }
 0x591   :  { %v696_v26 = vpop.permute.xlu0 %695 }
 0x592   :  { %v3254_v27 = vadd.f32 %v696_v26, %v688_v24  ;;  %v599_v28 = vpop.permute.xlu1 %598 }
 0x593   :  { %v3256_v29 = vadd.f32 %v599_v28, %v591_v25 }
 0x594   :  { %2828 = vtanh.f32 %v3254_v27 }
 0x595   :  { %2830 = vtanh.f32 %v3256_v29 }
 0x59e   :  { %v2829_v30 = vpop.eup %2828 }
 0x59f   :  { %v2831_v31 = vpop.eup %2830  ;;  %701 = vrot.lane.b32.xlu0 %v2829_v30, %s2940_s1 }
 0x5a0   :  { %604 = vrot.lane.b32.xlu1 %v2831_v31, %s2940_s1 }
 0x611   :  { %v702_v32 = vpop.permute.xlu0 %701 }
 0x612   :  { %v704_v33 = vmul.f32 %v2825_v13, %v702_v32  ;;  %v605_v34 = vpop.permute.xlu1 %604 }
 0x613   :  { %v607_v35 = vmul.f32 %v2827_v17, %v605_v34 }
 0x614   :  { %706 = vrot.lane.b32.xlu1 %v704_v33, %s2941_s5 }
 0x615   :  { %710 = vrot.lane.b32.xlu0 %v607_v35, %s2942_s6 }
 0x686   :  { %v707_v36 = vpop.permute.xlu1 %706 }
 0x687   :  { %2449 = vmatmul.mubr.msk.f32.vlgmr.msra.gmra.mrb[12].mxu1 %vm107_vm1, %v707_v36  ;;  %v711_v37 = vpop.permute.xlu0 %710 }
 0x688   :  { %v713_v38 = vsel %vm107_vm1, %v707_v36, %v711_v37  ;;  %2693 = vmatpush3.bf16.msra.mxu1 %v3182_v39  ;;  %2467 = vmatprep.mubr.msk.f32.mxu1 %vm2937_vm0, %v2938_v4 }
 0x689   :  { %2438 = vmatmul.mubr.msk.f32.vlgmr.msra.gmra.mrb[16].mxu0 %vm506_vm12, %v713_v38  ;;  %2694 = vmatprep.subr.bf16.mxu1 %v2936_v0 }
 0x68a   :  { %2705 = vmatpush3.bf16.msra.mxu0 %v3104_v52  ;;  %2478 = vmatprep.mubr.msk.f32.mxu0 %vm2937_vm0, %v2938_v4 }
 0x68b   :  { %2706 = vmatprep.subr.bf16.mxu0 %v2936_v0 }
 0x68c   :  { %2696 = vmatpush3.bf16.msra.mxu1 %v3188_v41 }
 0x68d   :  { %2697 = vmatprep.subr.bf16.mxu1 %v2936_v0 }
 0x68e   :  { %2708 = vmatpush3.bf16.msra.mxu0 %v3121_v58 }
 0x68f   :  { %2709 = vmatprep.subr.bf16.mxu0 %v2936_v0 }
 0x690   :  { %2699 = vmatpush3.bf16.msra.mxu1 %v3198_v44 }
 0x691   :  { %2700 = vmatprep.subr.bf16.mxu1 %v2936_v0 }
 0x694   :  { %2702 = vmatpush3.bf16.msra.mxu1 %v3212_v49 }
 0x695   :  { %2721 = vmatprep.subr.bf16.mxu1 %v2936_v0 }
 0x75a   :  { %v879_v40 = vpop.f32.mrb[12].mxu1 }
 0x75b   :  { %v883_v42 = vadd.f32 %v879_v40, %v3158_v12  ;;  %v2450_v43 = vpop.f32.mrb[13].mxu1 }
 0x75c   :  { %v783_v45 = vpop.f32.mrb[16].mxu0 }
 0x75d   :  { %2832 = vtanh.f32 %v883_v42  ;;  %v784_v46 = vadd.f32 %v3241_v56, %v783_v45  ;;  %v2439_v47 = vpop.f32.mrb[17].mxu0  ;;  %v2157_v51 = vmul.f32 -1.442695, %v883_v42 }
 0x75f   :  { %2834 = vtanh.f32 %v784_v46  ;;  %v2155_v53 = vmul.f32 -1.442695, %v784_v46 }
 0x760   :  { %2836 = vpow2.f32 %v2157_v51 }
 0x761   :  { %2838 = vpow2.f32 %v2155_v53 }
 0x767   :  { %v2833_v48 = vpop.eup %2832 }
 0x768   :  { %893 = vrot.lane.b32.xlu0 %v2833_v48, %s2940_s1 }
 0x769   :  { %v2835_v50 = vpop.eup %2834 }
 0x76a   :  { %796 = vrot.lane.b32.xlu1 %v2835_v50, %s2940_s1  ;;  %v2837_v54 = vpop.eup %2836 }
 0x76b   :  { %v2839_v55 = vpop.eup %2838  ;;  %v887_v12 = vadd.f32 1.0, %v2837_v54 }
 0x76c   :  { %v790_v57 = vadd.f32 1.0, %v2839_v55 }
 0x76d   :  { %2840 = vrcp.f32 %v887_v12 }
 0x76e   :  { %2842 = vrcp.f32 %v790_v57 }
 0x777   :  { %v2841_v59 = vpop.eup %2840 }
 0x778   :  { %v2843_v62 = vpop.eup %2842  ;;  %v891_v2 = vmul.f32 %v2841_v59, %v3254_v27 }
 0x779   :  { %v794_v6 = vmul.f32 %v2843_v62, %v3256_v29 }
 0x7da   :  { %v894_v60 = vpop.permute.xlu0 %893 }
 0x7db   :  { %v896_v61 = vmul.f32 %v2841_v59, %v894_v60 }
 0x7dc   :  { %v797_v63 = vpop.permute.xlu1 %796 }
 0x7dd   :  { %898 = vrot.lane.b32.xlu0 %v896_v61, %s2940_s1  ;;  %v799_v1 = vmul.f32 %v2843_v62, %v797_v63 }
 0x7df   :  { %801 = vrot.lane.b32.xlu1 %v799_v1, %s2940_s1 }
 0x84f   :  { %v899_v3 = vpop.permute.xlu0 %898 }
 0x850   :  { %v3290_v5 = vadd.f32 %v899_v3, %v891_v2 }
 0x851   :  { %v802_v7 = vpop.permute.xlu1 %801 }
 0x852   :  { %2844 = vtanh.f32 %v3290_v5  ;;  %v3294_v8 = vadd.f32 %v802_v7, %v794_v6 }
 0x854   :  { %2846 = vtanh.f32 %v3294_v8 }
 0x85c   :  { %v2845_v9 = vpop.eup %2844 }
 0x85d   :  { %904 = vrot.lane.b32.xlu0 %v2845_v9, %s2940_s1 }
 0x85e   :  { %v2847_v11 = vpop.eup %2846 }
 0x85f   :  { %807 = vrot.lane.b32.xlu1 %v2847_v11, %s2940_s1 }
 0x8cf   :  { %v905_v13 = vpop.permute.xlu0 %904 }
 0x8d0   :  { %v907_v15 = vmul.f32 %v2841_v59, %v905_v13 }
 0x8d1   :  { %v808_v17 = vpop.permute.xlu1 %807 }
 0x8d2   :  { %909 = vrot.lane.b32.xlu1 %v907_v15, %s2941_s5  ;;  %v810_v19 = vmul.f32 %v2843_v62, %v808_v17 }
 0x8d4   :  { %913 = vrot.lane.b32.xlu0 %v810_v19, %s2942_s6 }
 0x944   :  { %v910_v21 = vpop.permute.xlu1 %909 }
 0x945   :  { %2479 = vmatmul.mubr.msk.f32.vlgmr.msra.gmra.mrb[18].mxu0 %vm107_vm1, %v910_v21 }
 0x946   :  { %2711 = vmatpush3.bf16.msra.mxu0 %v3182_v39  ;;  %2497 = vmatprep.mubr.msk.f32.mxu0 %vm2937_vm0, %v2938_v4  ;;  %v914_v22 = vpop.permute.xlu0 %913 }
 0x947   :  { %2712 = vmatprep.subr.bf16.mxu0 %v2936_v0  ;;  %v916_v23 = vsel %vm107_vm1, %v910_v21, %v914_v22 }
 0x948   :  { %2468 = vmatmul.mubr.msk.f32.vlgmr.msra.gmra.mrb[14].mxu1 %vm506_vm12, %v916_v23 }
 0x949   :  { %2723 = vmatpush3.bf16.msra.mxu1 %v3104_v52  ;;  %2508 = vmatprep.mubr.msk.f32.mxu1 %vm2937_vm0, %v2938_v4 }
 0x94a   :  { %2714 = vmatpush3.bf16.msra.mxu0 %v3188_v41  ;;  %2724 = vmatprep.subr.bf16.mxu1 %v2936_v0 }
 0x94b   :  { %2715 = vmatprep.subr.bf16.mxu0 %v2936_v0 }
 0x94d   :  { %2726 = vmatpush3.bf16.msra.mxu1 %v3121_v58 }
 0x94e   :  { %2717 = vmatpush3.bf16.msra.mxu0 %v3198_v44  ;;  %2727 = vmatprep.subr.bf16.mxu1 %v2936_v0 }
 0x94f   :  { %2718 = vmatprep.subr.bf16.mxu0 %v2936_v0 }
 0x952   :  { %2720 = vmatpush3.bf16.msra.mxu0 %v3212_v49 }
 0x953   :  { %2739 = vmatprep.subr.bf16.mxu0 %v2936_v0 }
 0xa18   :  { %v1082_v24 = vpop.f32.mrb[18].mxu0 }
 0xa19   :  { %v1086_v25 = vadd.f32 %v1082_v24, %v3156_v10  ;;  %v2480_v26 = vpop.f32.mrb[19].mxu0 }
 0xa1b   :  { %2848 = vtanh.f32 %v1086_v25  ;;  %v986_v27 = vpop.f32.mrb[14].mxu1  ;;  %v2161_v32 = vmul.f32 -1.442695, %v1086_v25 }
 0xa1c   :  { %v987_v28 = vadd.f32 %v3241_v56, %v986_v27  ;;  %v2469_v29 = vpop.f32.mrb[15].mxu1 }
 0xa1e   :  { %2850 = vtanh.f32 %v987_v28  ;;  %v2159_v33 = vmul.f32 -1.442695, %v987_v28 }
 0xa1f   :  { %2852 = vpow2.f32 %v2161_v32 }
 0xa20   :  { %2854 = vpow2.f32 %v2159_v33 }
 0xa25   :  { %v2849_v30 = vpop.eup %2848 }
 0xa26   :  { %1096 = vrot.lane.b32.xlu0 %v2849_v30, %s2940_s1 }
 0xa28   :  { %v2851_v31 = vpop.eup %2850 }
 0xa29   :  { %999 = vrot.lane.b32.xlu1 %v2851_v31, %s2940_s1  ;;  %v2853_v34 = vpop.eup %2852 }
 0xa2a   :  { %v1090_v35 = vadd.f32 1.0, %v2853_v34  ;;  %v2855_v10 = vpop.eup %2854 }
 0xa2b   :  { %v993_v36 = vadd.f32 1.0, %v2855_v10 }
 0xa2c   :  { %2856 = vrcp.f32 %v1090_v35 }
 0xa2d   :  { %2858 = vrcp.f32 %v993_v36 }
 0xa36   :  { %v2857_v37 = vpop.eup %2856 }
 0xa37   :  { %v2859_v42 = vpop.eup %2858  ;;  %v1094_v46 = vmul.f32 %v2857_v37, %v3290_v5 }
 0xa38   :  { %v997_v50 = vmul.f32 %v2859_v42, %v3294_v8 }
 0xa98   :  { %v1097_v38 = vpop.permute.xlu0 %1096 }
 0xa99   :  { %v1099_v40 = vmul.f32 %v2857_v37, %v1097_v38 }
 0xa9b   :  { %1101 = vrot.lane.b32.xlu0 %v1099_v40, %s2940_s1  ;;  %v1000_v43 = vpop.permute.xlu1 %999 }
 0xa9c   :  { %v1002_v45 = vmul.f32 %v2859_v42, %v1000_v43 }
 0xa9e   :  { %1004 = vrot.lane.b32.xlu1 %v1002_v45, %s2940_s1 }
 0xb0d   :  { %v1102_v47 = vpop.permute.xlu0 %1101 }
 0xb0e   :  { %v3327_v48 = vadd.f32 %v1102_v47, %v1094_v46 }
 0xb10   :  { %2860 = vtanh.f32 %v3327_v48  ;;  %v1005_v51 = vpop.permute.xlu1 %1004 }
 0xb11   :  { %v3331_v53 = vadd.f32 %v1005_v51, %v997_v50 }
 0xb13   :  { %2862 = vtanh.f32 %v3331_v53 }
 0xb1a   :  { %v2861_v54 = vpop.eup %2860 }
 0xb1b   :  { %1107 = vrot.lane.b32.xlu0 %v2861_v54, %s2940_s1 }
 0xb1d   :  { %v2863_v55 = vpop.eup %2862 }
 0xb1e   :  { %1010 = vrot.lane.b32.xlu1 %v2863_v55, %s2940_s1 }
 0xb8d   :  { %v1108_v12 = vpop.permute.xlu0 %1107 }
 0xb8e   :  { %v1110_v57 = vmul.f32 %v2857_v37, %v1108_v12 }
 0xb90   :  { %1112 = vrot.lane.b32.xlu1 %v1110_v57, %s2941_s5  ;;  %v1011_v59 = vpop.permute.xlu1 %1010 }
 0xb91   :  { %v1013_v60 = vmul.f32 %v2859_v42, %v1011_v59 }
 0xb93   :  { %1116 = vrot.lane.b32.xlu0 %v1013_v60, %s2942_s6 }
 0xc02   :  { %v1113_v61 = vpop.permute.xlu1 %1112 }
 0xc03   :  { %2509 = vmatmul.mubr.msk.f32.vlgmr.msra.gmra.mrb[16].mxu1 %vm107_vm1, %v1113_v61 }
 0xc04   :  { %2729 = vmatpush3.bf16.msra.mxu1 %v3182_v39  ;;  %2527 = vmatprep.mubr.msk.f32.mxu1 %vm2937_vm0, %v2938_v4 }
 0xc05   :  { %2730 = vmatprep.subr.bf16.mxu1 %v2936_v0  ;;  %v1117_v62 = vpop.permute.xlu0 %1116 }
 0xc06   :  { %v1119_v63 = vsel %vm107_vm1, %v1113_v61, %v1117_v62 }
 0xc07   :  { %2498 = vmatmul.mubr.msk.f32.vlgmr.msra.gmra.mrb[20].mxu0 %vm506_vm12, %v1119_v63 }
 0xc08   :  { %2732 = vmatpush3.bf16.msra.mxu1 %v3188_v41  ;;  %2741 = vmatpush3.bf16.msra.mxu0 %v3104_v52 }
 0xc09   :  { %2733 = vmatprep.subr.bf16.mxu1 %v2936_v0  ;;  %2742 = vmatprep.subr.bf16.mxu0 %v2936_v0 }
 0xc0a   :  { %2538 = vmatprep.mubr.msk.f32.mxu0 %vm2937_vm0, %v2938_v4 }
 0xc0c   :  { %2735 = vmatpush3.bf16.msra.mxu1 %v3198_v44  ;;  %2744 = vmatpush3.bf16.msra.mxu0 %v3121_v58 }
 0xc0d   :  { %2736 = vmatprep.subr.bf16.mxu1 %v2936_v0  ;;  %2745 = vmatprep.subr.bf16.mxu0 %v2936_v0 }
 0xc10   :  { %2738 = vmatpush3.bf16.msra.mxu1 %v3212_v49 }
 0xc11   :  { %2757 = vmatprep.subr.bf16.mxu1 %v2936_v0 }
 0xcd6   :  { %v1285_v1 = vpop.f32.mrb[16].mxu1 }
 0xcd7   :  { %v1289_v2 = vadd.f32 %v1285_v1, %v3162_v16  ;;  %v2510_v3 = vpop.f32.mrb[17].mxu1 }
 0xcd9   :  { %2864 = vtanh.f32 %v1289_v2  ;;  %v2165_v11 = vmul.f32 -1.442695, %v1289_v2 }
 0xcda   :  { %v1189_v5 = vpop.f32.mrb[20].mxu0 }
 0xcdb   :  { %v1190_v6 = vadd.f32 %v3241_v56, %v1189_v5  ;;  %v2499_v7 = vpop.f32.mrb[21].mxu0 }
 0xcdd   :  { %2866 = vtanh.f32 %v1190_v6  ;;  %v2163_v13 = vmul.f32 -1.442695, %v1190_v6 }
 0xcde   :  { %2868 = vpow2.f32 %v2165_v11 }
 0xcdf   :  { %2870 = vpow2.f32 %v2163_v13 }
 0xce3   :  { %v2865_v8 = vpop.eup %2864 }
 0xce4   :  { %1299 = vrot.lane.b32.xlu0 %v2865_v8, %s2940_s1 }
 0xce7   :  { %v2867_v9 = vpop.eup %2866 }
 0xce8   :  { %1202 = vrot.lane.b32.xlu1 %v2867_v9, %s2940_s1  ;;  %v2869_v15 = vpop.eup %2868 }
 0xce9   :  { %v1293_v17 = vadd.f32 1.0, %v2869_v15  ;;  %v2871_v16 = vpop.eup %2870 }
 0xcea   :  { %v1196_v19 = vadd.f32 1.0, %v2871_v16 }
 0xceb   :  { %2872 = vrcp.f32 %v1293_v17 }
 0xcec   :  { %2874 = vrcp.f32 %v1196_v19 }
 0xcf5   :  { %v2873_v21 = vpop.eup %2872 }
 0xcf6   :  { %v2875_v24 = vpop.eup %2874  ;;  %v1297_v27 = vmul.f32 %v2873_v21, %v3327_v48 }
 0xcf7   :  { %v1200_v30 = vmul.f32 %v2875_v24, %v3331_v53 }
 0xd56   :  { %v1300_v22 = vpop.permute.xlu0 %1299 }
 0xd57   :  { %v1302_v23 = vmul.f32 %v2873_v21, %v1300_v22 }
 0xd59   :  { %1304 = vrot.lane.b32.xlu0 %v1302_v23, %s2940_s1 }
 0xd5a   :  { %v1203_v25 = vpop.permute.xlu1 %1202 }
 0xd5b   :  { %v1205_v26 = vmul.f32 %v2875_v24, %v1203_v25 }
 0xd5d   :  { %1207 = vrot.lane.b32.xlu1 %v1205_v26, %s2940_s1 }
 0xdcb   :  { %v1305_v28 = vpop.permute.xlu0 %1304 }
 0xdcc   :  { %v3364_v29 = vadd.f32 %v1305_v28, %v1297_v27 }
 0xdce   :  { %2876 = vtanh.f32 %v3364_v29 }
 0xdcf   :  { %v1208_v31 = vpop.permute.xlu1 %1207 }
 0xdd0   :  { %v3368_v32 = vadd.f32 %v1208_v31, %v1200_v30 }
 0xdd2   :  { %2878 = vtanh.f32 %v3368_v32 }
 0xdd8   :  { %v2877_v33 = vpop.eup %2876 }
 0xdd9   :  { %1310 = vrot.lane.b32.xlu0 %v2877_v33, %s2940_s1 }
 0xddc   :  { %v2879_v34 = vpop.eup %2878 }
 0xddd   :  { %1213 = vrot.lane.b32.xlu1 %v2879_v34, %s2940_s1 }
 0xe4b   :  { %v1311_v35 = vpop.permute.xlu0 %1310 }
 0xe4c   :  { %v1313_v10 = vmul.f32 %v2873_v21, %v1311_v35 }
 0xe4e   :  { %1315 = vrot.lane.b32.xlu1 %v1313_v10, %s2941_s5 }
 0xe4f   :  { %v1214_v36 = vpop.permute.xlu1 %1213 }
 0xe50   :  { %v1216_v37 = vmul.f32 %v2875_v24, %v1214_v36 }
 0xe52   :  { %1319 = vrot.lane.b32.xlu0 %v1216_v37, %s2942_s6 }
 0xec0   :  { %v1316_v38 = vpop.permute.xlu1 %1315 }
 0xec1   :  { %2539 = vmatmul.mubr.msk.f32.vlgmr.msra.gmra.mrb[22].mxu0 %vm107_vm1, %v1316_v38 }
 0xec2   :  { %2747 = vmatpush3.bf16.msra.mxu0 %v3182_v39  ;;  %2557 = vmatprep.mubr.msk.f32.mxu0 %vm2937_vm0, %v2938_v4 }
 0xec3   :  { %2748 = vmatprep.subr.bf16.mxu0 %v2936_v0 }
 0xec4   :  { %v1320_v40 = vpop.permute.xlu0 %1319 }
 0xec5   :  { %v1322_v42 = vsel %vm107_vm1, %v1316_v38, %v1320_v40 }
 0xec6   :  { %2750 = vmatpush3.bf16.msra.mxu0 %v3188_v41  ;;  %2528 = vmatmul.mubr.msk.f32.vlgmr.msra.gmra.mrb[18].mxu1 %vm506_vm12, %v1322_v42 }
 0xec7   :  { %2751 = vmatprep.subr.bf16.mxu0 %v2936_v0  ;;  %2759 = vmatpush3.bf16.msra.mxu1 %v3104_v52 }
 0xec8   :  { %2568 = vmatprep.mubr.msk.f32.mxu1 %vm2937_vm0, %v2938_v4  ;;  %2760 = vmatprep.subr.bf16.mxu1 %v2936_v0 }
 0xeca   :  { %2753 = vmatpush3.bf16.msra.mxu0 %v3198_v44 }
 0xecb   :  { %2754 = vmatprep.subr.bf16.mxu0 %v2936_v0  ;;  %2762 = vmatpush3.bf16.msra.mxu1 %v3121_v58 }
 0xecc   :  { %2763 = vmatprep.subr.bf16.mxu1 %v2936_v0 }
 0xece   :  { %2756 = vmatpush3.bf16.msra.mxu0 %v3212_v49 }
 0xecf   :  { %2775 = vmatprep.subr.bf16.mxu0 %v2936_v0 }
 0xf94   :  { %v1488_v43 = vpop.f32.mrb[22].mxu0 }
 0xf95   :  { %v1492_v45 = vadd.f32 %v1488_v43, %v3160_v14  ;;  %v2540_v46 = vpop.f32.mrb[23].mxu0 }
 0xf97   :  { %2880 = vtanh.f32 %v1492_v45  ;;  %v2169_v54 = vmul.f32 -1.442695, %v1492_v45 }
 0xf99   :  { %v1392_v47 = vpop.f32.mrb[18].mxu1 }
 0xf9a   :  { %v1393_v48 = vadd.f32 %v3241_v56, %v1392_v47  ;;  %v2529_v50 = vpop.f32.mrb[19].mxu1 }
 0xf9c   :  { %2882 = vtanh.f32 %v1393_v48  ;;  %v2167_v55 = vmul.f32 -1.442695, %v1393_v48 }
 0xf9d   :  { %2884 = vpow2.f32 %v2169_v54 }
 0xf9e   :  { %2886 = vpow2.f32 %v2167_v55 }
 0xfa1   :  { %v2881_v51 = vpop.eup %2880 }
 0xfa2   :  { %1502 = vrot.lane.b32.xlu0 %v2881_v51, %s2940_s1 }
 0xfa6   :  { %v2883_v53 = vpop.eup %2882 }
 0xfa7   :  { %1405 = vrot.lane.b32.xlu1 %v2883_v53, %s2940_s1  ;;  %v2885_v12 = vpop.eup %2884 }
 0xfa8   :  { %v1496_v57 = vadd.f32 1.0, %v2885_v12  ;;  %v2887_v14 = vpop.eup %2886 }
 0xfa9   :  { %v1399_v59 = vadd.f32 1.0, %v2887_v14 }
 0xfaa   :  { %2888 = vrcp.f32 %v1496_v57 }
 0xfab   :  { %2890 = vrcp.f32 %v1399_v59 }
 0xfb4   :  { %v2889_v60 = vpop.eup %2888 }
 0xfb5   :  { %v2891_v63 = vpop.eup %2890  ;;  %v1500_v3 = vmul.f32 %v2889_v60, %v3364_v29 }
 0xfb6   :  { %v1403_v7 = vmul.f32 %v2891_v63, %v3368_v32 }
0x1014   :  { %v1503_v61 = vpop.permute.xlu0 %1502 }
0x1015   :  { %v1505_v62 = vmul.f32 %v2889_v60, %v1503_v61 }
0x1017   :  { %1507 = vrot.lane.b32.xlu0 %v1505_v62, %s2940_s1 }
0x1019   :  { %v1406_v1 = vpop.permute.xlu1 %1405 }
0x101a   :  { %v1408_v2 = vmul.f32 %v2891_v63, %v1406_v1 }
0x101c   :  { %1410 = vrot.lane.b32.xlu1 %v1408_v2, %s2940_s1 }
0x1089   :  { %v1508_v5 = vpop.permute.xlu0 %1507 }
0x108a   :  { %v3401_v6 = vadd.f32 %v1508_v5, %v1500_v3 }
0x108c   :  { %2892 = vtanh.f32 %v3401_v6 }
0x108e   :  { %v1411_v8 = vpop.permute.xlu1 %1410 }
0x108f   :  { %v3405_v9 = vadd.f32 %v1411_v8, %v1403_v7 }
0x1091   :  { %2894 = vtanh.f32 %v3405_v9 }
0x1096   :  { %v2893_v11 = vpop.eup %2892 }
0x1097   :  { %1513 = vrot.lane.b32.xlu0 %v2893_v11, %s2940_s1 }
0x109b   :  { %v2895_v13 = vpop.eup %2894 }
0x109c   :  { %1416 = vrot.lane.b32.xlu1 %v2895_v13, %s2940_s1 }
0x1109   :  { %v1514_v15 = vpop.permute.xlu0 %1513 }
0x110a   :  { %v1516_v17 = vmul.f32 %v2889_v60, %v1514_v15 }
0x110c   :  { %1518 = vrot.lane.b32.xlu1 %v1516_v17, %s2941_s5 }
0x110e   :  { %v1417_v16 = vpop.permute.xlu1 %1416 }
0x110f   :  { %v1419_v19 = vmul.f32 %v2891_v63, %v1417_v16 }
0x1111   :  { %1522 = vrot.lane.b32.xlu0 %v1419_v19, %s2942_s6 }
0x117e   :  { %v1519_v21 = vpop.permute.xlu1 %1518 }
0x117f   :  { %2569 = vmatmul.mubr.msk.f32.vlgmr.msra.gmra.mrb[20].mxu1 %vm107_vm1, %v1519_v21 }
0x1180   :  { %2765 = vmatpush3.bf16.msra.mxu1 %v3182_v39  ;;  %2587 = vmatprep.mubr.msk.f32.mxu1 %vm2937_vm0, %v2938_v4 }
0x1181   :  { %2766 = vmatprep.subr.bf16.mxu1 %v2936_v0 }
0x1183   :  { %v1523_v22 = vpop.permute.xlu0 %1522 }
0x1184   :  { %2768 = vmatpush3.bf16.msra.mxu1 %v3188_v41  ;;  %v1525_v23 = vsel %vm107_vm1, %v1519_v21, %v1523_v22 }
0x1185   :  { %2769 = vmatprep.subr.bf16.mxu1 %v2936_v0  ;;  %2558 = vmatmul.mubr.msk.f32.vlgmr.msra.gmra.mrb[24].mxu0 %vm506_vm12, %v1525_v23 }
0x1186   :  { %2777 = vmatpush3.bf16.msra.mxu0 %v3104_v52  ;;  %2598 = vmatprep.mubr.msk.f32.mxu0 %vm2937_vm0, %v2938_v4 }
0x1187   :  { %2778 = vmatprep.subr.bf16.mxu0 %v2936_v0 }
0x1188   :  { %2771 = vmatpush3.bf16.msra.mxu1 %v3198_v44 }
0x1189   :  { %2772 = vmatprep.subr.bf16.mxu1 %v2936_v0 }
0x118a   :  { %2780 = vmatpush3.bf16.msra.mxu0 %v3121_v58 }
0x118b   :  { %2781 = vmatprep.subr.bf16.mxu0 %v2936_v0 }
0x118c   :  { %2774 = vmatpush3.bf16.msra.mxu1 %v3212_v49 }
0x118d   :  { %2793 = vmatprep.subr.bf16.mxu1 %v2936_v0 }
0x1252   :  { %v1691_v24 = vpop.f32.mrb[20].mxu1 }
0x1253   :  { %v1695_v52 = vadd.f32 %v1691_v24, %v3166_v20  ;;  %v2570_v25 = vpop.f32.mrb[21].mxu1 }
0x1255   :  { %2896 = vtanh.f32 %v1695_v52  ;;  %v2173_v30 = vmul.f32 -1.442695, %v1695_v52 }
0x1258   :  { %v1595_v26 = vpop.f32.mrb[24].mxu0 }
0x1259   :  { %v1596_v27 = vadd.f32 %v3241_v56, %v1595_v26  ;;  %v2559_v28 = vpop.f32.mrb[25].mxu0 }
0x125b   :  { %2898 = vtanh.f32 %v1596_v27  ;;  %v2171_v31 = vmul.f32 -1.442695, %v1596_v27 }
0x125c   :  { %2900 = vpow2.f32 %v2173_v30 }
0x125d   :  { %2902 = vpow2.f32 %v2171_v31 }
0x125f   :  { %v2897_v29 = vpop.eup %2896 }
0x1260   :  { %1705 = vrot.lane.b32.xlu0 %v2897_v29, %s2940_s1 }
0x1265   :  { %v2899_v58 = vpop.eup %2898 }
0x1266   :  { %1608 = vrot.lane.b32.xlu1 %v2899_v58, %s2940_s1  ;;  %v2901_v32 = vpop.eup %2900 }
0x1267   :  { %v1699_v33 = vadd.f32 1.0, %v2901_v32  ;;  %v2903_v20 = vpop.eup %2902 }
0x1268   :  { %v1602_v34 = vadd.f32 1.0, %v2903_v20 }
0x1269   :  { %2904 = vrcp.f32 %v1699_v33 }
0x126a   :  { %2906 = vrcp.f32 %v1602_v34 }
0x1273   :  { %v2905_v35 = vpop.eup %2904 }
0x1274   :  { %v2907_v37 = vpop.eup %2906  ;;  %v1703_v42 = vmul.f32 %v2905_v35, %v3401_v6 }
0x1275   :  { %v1606_v46 = vmul.f32 %v2907_v37, %v3405_v9 }
0x12d2   :  { %v1706_v10 = vpop.permute.xlu0 %1705 }
0x12d3   :  { %v1708_v36 = vmul.f32 %v2905_v35, %v1706_v10 }
0x12d5   :  { %1710 = vrot.lane.b32.xlu0 %v1708_v36, %s2940_s1 }
0x12d8   :  { %v1609_v38 = vpop.permute.xlu1 %1608 }
0x12d9   :  { %v1611_v40 = vmul.f32 %v2907_v37, %v1609_v38 }
0x12db   :  { %1613 = vrot.lane.b32.xlu1 %v1611_v40, %s2940_s1 }
0x1347   :  { %v1711_v43 = vpop.permute.xlu0 %1710 }
0x1348   :  { %v1713_v45 = vadd.f32 %v1711_v43, %v1703_v42  ;;  %v2030_v43 = vld [vmem:[%s3503_s9 + $0x8] sm:$0xff] }
0x134a   :  { %2908 = vtanh.f32 %v1713_v45 }
0x134d   :  { %v1614_v47 = vpop.permute.xlu1 %1613 }
0x134e   :  { %v1616_v48 = vadd.f32 %v1614_v47, %v1606_v46  ;;  %v2032_v47 = vld [vmem:[%s3503_s9 + $0x18] sm:$0xff] }
0x1350   :  { %2910 = vtanh.f32 %v1616_v48 }
0x1354   :  { %v2909_v50 = vpop.eup %2908 }
0x1355   :  { %1716 = vrot.lane.b32.xlu0 %v2909_v50, %s2940_s1 }
0x135a   :  { %v2911_v51 = vpop.eup %2910 }
0x135b   :  { %1619 = vrot.lane.b32.xlu1 %v2911_v51, %s2940_s1 }
0x13c7   :  { %v1717_v53 = vpop.permute.xlu0 %1716 }
0x13c8   :  { %v1719_v54 = vmul.f32 %v2905_v35, %v1717_v53 }
0x13ca   :  { %1721 = vrot.lane.b32.xlu1 %v1719_v54, %s2941_s5 }
0x13cd   :  { %v1620_v55 = vpop.permute.xlu1 %1619 }
0x13ce   :  { %v1622_v12 = vmul.f32 %v2907_v37, %v1620_v55  ;;  %v2180_v55 = vld [vmem:[%s3504_s10] ss:$0 sm:$0xff] }
0x13d0   :  { %1725 = vrot.lane.b32.xlu0 %v1622_v12, %s2942_s6 }
0x143c   :  { %v1722_v57 = vpop.permute.xlu1 %1721 }
0x143d   :  { %2599 = vmatmul.mubr.msk.f32.vlgmr.msra.gmra.mrb[26].mxu0 %vm107_vm1, %v1722_v57 }
0x143e   :  { %2783 = vmatpush3.bf16.msra.mxu0 %v3182_v39  ;;  %2617 = vmatprep.mubr.msk.f32.mxu0 %vm2937_vm0, %v2938_v4 }
0x143f   :  { %2784 = vmatprep.subr.bf16.mxu0 %v2936_v0 }
0x1442   :  { %2786 = vmatpush3.bf16.msra.mxu0 %v3188_v41  ;;  %v1726_v14 = vpop.permute.xlu0 %1725 }
0x1443   :  { %2787 = vmatprep.subr.bf16.mxu0 %v2936_v0  ;;  %v1728_v59 = vsel %vm107_vm1, %v1722_v57, %v1726_v14 }
0x1444   :  { %2588 = vmatmul.mubr.msk.f32.vlgmr.msra.gmra.mrb[22].mxu1 %vm506_vm12, %v1728_v59 }
0x1445   :  { %2628 = vmatprep.mubr.msk.f32.mxu1 %vm2937_vm0, %v2938_v4 }
0x1446   :  { %2789 = vmatpush3.bf16.msra.mxu0 %v3198_v44 }
0x1447   :  { %2790 = vmatprep.subr.bf16.mxu0 %v2936_v0 }
0x144a   :  { %2792 = vmatpush3.bf16.msra.mxu0 %v3212_v49 }
0x1510   :  { %v1894_v39 = vpop.f32.mrb[26].mxu0 }
0x1511   :  { %v1898_v60 = vadd.f32 %v1894_v39, %v3164_v18  ;;  %v2600_v41 = vpop.f32.mrb[27].mxu0 }
0x1513   :  { %2912 = vtanh.f32 %v1898_v60  ;;  %v2177_v4 = vmul.f32 -1.442695, %v1898_v60 }
0x1517   :  { %v1798_v61 = vpop.f32.mrb[22].mxu1 }
0x1518   :  { %v1799_v62 = vadd.f32 %v3241_v56, %v1798_v61  ;;  %v2589_v63 = vpop.f32.mrb[23].mxu1 }
0x151a   :  { %2914 = vtanh.f32 %v1799_v62  ;;  %v2175_v2 = vmul.f32 -1.442695, %v1799_v62 }
0x151b   :  { %2916 = vpow2.f32 %v2177_v4 }
0x151c   :  { %2918 = vpow2.f32 %v2175_v2 }
0x151d   :  { %v2913_v1 = vpop.eup %2912 }
0x151e   :  { %1908 = vrot.lane.b32.xlu0 %v2913_v1, %s2940_s1 }
0x1524   :  { %v2915_v44 = vpop.eup %2914 }
0x1525   :  { %1811 = vrot.lane.b32.xlu1 %v2915_v44, %s2940_s1  ;;  %v2917_v49 = vpop.eup %2916 }
0x1526   :  { %v1902_v3 = vadd.f32 1.0, %v2917_v49  ;;  %v2919_v18 = vpop.eup %2918 }
0x1527   :  { %v1805_v5 = vadd.f32 1.0, %v2919_v18 }
0x1528   :  { %2920 = vrcp.f32 %v1902_v3 }
0x1529   :  { %2922 = vrcp.f32 %v1805_v5 }
0x1532   :  { %v2921_v6 = vpop.eup %2920 }
0x1533   :  { %v2923_v9 = vpop.eup %2922  ;;  %v1906_v15 = vmul.f32 %v2921_v6, %v1713_v45  ;;  %v2031_v45 = vld [vmem:[%s3503_s9 + $0x10] sm:$0xff] }
0x1534   :  { %v1809_v19 = vmul.f32 %v2923_v9, %v1616_v48  ;;  %v2797_v48 = vpack.c.bf16 %v2032_v47, %v2031_v45 }
0x1590   :  { %v1909_v7 = vpop.permute.xlu0 %1908 }
0x1591   :  { %v1911_v8 = vmul.f32 %v2921_v6, %v1909_v7 }
0x1593   :  { %1913 = vrot.lane.b32.xlu0 %v1911_v8, %s2940_s1 }
0x1597   :  { %v1812_v11 = vpop.permute.xlu1 %1811 }
0x1598   :  { %v1814_v13 = vmul.f32 %v2923_v9, %v1812_v11 }
0x159a   :  { %1816 = vrot.lane.b32.xlu1 %v1814_v13, %s2940_s1 }
0x1605   :  { %v1914_v17 = vpop.permute.xlu0 %1913 }
0x1606   :  { %v1916_v16 = vadd.f32 %v1914_v17, %v1906_v15 }
0x1608   :  { %2924 = vtanh.f32 %v1916_v16 }
0x160c   :  { %v1817_v21 = vpop.permute.xlu1 %1816 }
0x160d   :  { %v1819_v22 = vadd.f32 %v1817_v21, %v1809_v19 }
0x160f   :  { %2926 = vtanh.f32 %v1819_v22 }
0x1612   :  { %v2925_v23 = vpop.eup %2924 }
0x1613   :  { %1919 = vrot.lane.b32.xlu0 %v2925_v23, %s2940_s1 }
0x1619   :  { %v2927_v24 = vpop.eup %2926 }
0x161a   :  { %1822 = vrot.lane.b32.xlu1 %v2927_v24, %s2940_s1 }
0x1685   :  { %v1920_v52 = vpop.permute.xlu0 %1919 }
0x1686   :  { %v1922_v25 = vmul.f32 %v2921_v6, %v1920_v52 }
0x1688   :  { %1924 = vrot.lane.b32.xlu1 %v1922_v25, %s2941_s5 }
0x168c   :  { %v1823_v26 = vpop.permute.xlu1 %1822 }
0x168d   :  { %v1825_v27 = vmul.f32 %v2923_v9, %v1823_v26 }
0x168f   :  { %1928 = vrot.lane.b32.xlu0 %v1825_v27, %s2942_s6 }
0x16fa   :  { %v1925_v28 = vpop.permute.xlu1 %1924 }
0x1701   :  { %v1929_v29 = vpop.permute.xlu0 %1928 }
0x1702   :  { %v1931_v58 = vsel %vm107_vm1, %v1925_v28, %v1929_v29 }
0x1703   :  { %2618 = vmatmul.mubr.msk.f32.vlgmr.msra.gmra.mrb[28].mxu0 %vm506_vm12, %v1931_v58 }
0x17d6   :  { %v2001_v30 = vpop.f32.mrb[28].mxu0 }
0x17d7   :  { %v2002_v31 = vadd.f32 %v3241_v56, %v2001_v30  ;;  %v2619_v32 = vpop.f32.mrb[29].mxu0  ;;  %v2029_v56 = vld [vmem:[%s3503_s9] sm:$0xff] }
0x17d8   :  { %v2794_v46 = vpack.c.bf16 %v2030_v43, %v2029_v56 }
0x17d9   :  { %2928 = vtanh.f32 %v2002_v31  ;;  %v2179_v20 = vmul.f32 -1.442695, %v2002_v31 }
0x17da   :  { %2795 = vmatpush3.bf16.msra.mxu1 %v2794_v46 }
0x17db   :  { %2930 = vpow2.f32 %v2179_v20  ;;  %2796 = vmatprep.subr.bf16.mxu1 %v2936_v0 }
0x17de   :  { %2798 = vmatpush3.bf16.msra.mxu1 %v2797_v48 }
0x17e3   :  { %v2929_v33 = vpop.eup %2928 }
0x17e4   :  { %2014 = vrot.lane.b32.xlu1 %v2929_v33, %s2940_s1 }
0x17e5   :  { %v2931_v34 = vpop.eup %2930 }
0x17e6   :  { %v2008_v35 = vadd.f32 1.0, %v2931_v34 }
0x17e8   :  { %2932 = vrcp.f32 %v2008_v35 }
0x17f2   :  { %v2933_v10 = vpop.eup %2932 }
0x17f3   :  { %v2012_v38 = vmul.f32 %v2933_v10, %v1819_v22 }
0x1856   :  { %v2015_v36 = vpop.permute.xlu1 %2014 }
0x1857   :  { %v2017_v37 = vmul.f32 %v2933_v10, %v2015_v36 }
0x1859   :  { %2019 = vrot.lane.b32.xlu0 %v2017_v37, %s2940_s1 }
0x18cb   :  { %v2020_v40 = vpop.permute.xlu0 %2019 }
0x18cc   :  { %v2022_v42 = vadd.f32 %v2020_v40, %v2012_v38 }
0x18ce   :  { %2934 = vtanh.f32 %v2022_v42 }
0x18d8   :  { %v2935_v50 = vpop.eup %2934 }
0x18d9   :  { %2025 = vrot.lane.b32.xlu1 %v2935_v50, %s2940_s1 }
0x194b   :  { %v2026_v51 = vpop.permute.xlu1 %2025 }
0x194c   :  { %v2028_v53 = vmul.f32 %v2933_v10, %v2026_v51 }
0x194e   :  { %2041 = vrot.lane.b32.xlu0 %v2028_v53, %s2941_s5 }
0x19c0   :  { %v2042_v54 = vpop.permute.xlu0 %2041 }
0x19c1   :  { %2629 = vmatmul.mubr.msk.f32.vlgmr.msra.gmra.mrb[24].mxu1 %vm107_vm1, %v2042_v54 }
0x1a94   :  { %v2111_v12 = vpop.f32.mrb[24].mxu1 }
0x1a95   :  { %v2112_v57 = vadd.f32 %v2180_v55, %v2111_v12  ;;  %v2630_v14 = vpop.f32.mrb[25].mxu1 }
0x1a97   :  { %2115 = vst [vmem:[%s3505_s11] sm:$0xff] %v2112_v57 }

</bundles_post_ra>
